<compile_context>
chip_gen: v6e
topology: v6e:2x2x1
jax: 0.10.0
libtpu: 0.0.40
codegen_flags: <defaults>
</compile_context>

<pallas_src>
import jax
import jax.numpy as jnp
from jax.experimental import pallas as pl
from jax.experimental.pallas import tpu as pltpu


# -----------------------------------------------------------------------------
# helpers
# -----------------------------------------------------------------------------
def _round_up(x, m):
    return (x + m - 1) // m * m


def _pick_row_tile(r):
    # <= 256 relations: a single lane/sublane-aligned tile; otherwise 256-row
    # tiles (bounded VMEM on v7x, good pipeline efficiency on v5e/v6e).
    if r <= 256:
        return _round_up(max(r, 16), 16)
    return 256


# -----------------------------------------------------------------------------
# fused relation kernel
# -----------------------------------------------------------------------------
def _rel_fused_kernel(
    ech_ref, ect_ref, un_ref, fb_ref,        # per-relation tiles (bf16/bf16/bf16/f32)
    wpeh_ref, bpeh_ref, wpet_ref, bpet_ref,  # post_emb split into head/tail cols
    wcath_ref, wcatt_ref, bcat_ref,          # post_cat split over the concat axis
    wup_ref, bup_ref,                        # up_dim
    wrel_ref,                                # rel_compress (bias folded into fb)
    wctxh_ref, wctxt_ref,                    # ctx_compress split (bias folded into fb)
    o_ref,
):
    f32 = jnp.float32
    bf16 = jnp.bfloat16

    # post_emb on gathered edge_ctx rows; f32 accumulate, f32 bias add.
    head = jnp.dot(ech_ref[...], wpeh_ref[...], preferred_element_type=f32) + bpeh_ref[...]
    tail = jnp.dot(ect_ref[...], wpet_ref[...], preferred_element_type=f32) + bpet_ref[...]
    head_b = head.astype(bf16)
    tail_b = tail.astype(bf16)

    # ctx_gate = post_cat(cat(head, tail))  -- concat folded into split weights.
    gate = (
        jnp.dot(head_b, wcath_ref[...], preferred_element_type=f32)
        + jnp.dot(tail_b, wcatt_ref[...], preferred_element_type=f32)
        + bcat_ref[...]
    )

    # visual_rep = ctx_gate * up_dim(union_features)   (gating kept in f32)
    vis = jnp.dot(un_ref[...], wup_ref[...], preferred_element_type=f32) + bup_ref[...]
    visual = gate * vis

    # rel_dists = rel_compress(visual) + ctx_compress(prod) + freq_bias(+biases)
    rel = jnp.dot(visual.astype(bf16), wrel_ref[...], preferred_element_type=f32)
    ctx = (
        jnp.dot(head_b, wctxh_ref[...], preferred_element_type=f32)
        + jnp.dot(tail_b, wctxt_ref[...], preferred_element_type=f32)
    )
    o_ref[...] = rel + ctx + fb_ref[...]


def rel_fused_pallas(ec_head, ec_tail, union_feat, fbias, kp, tr):
    r_pad, h = ec_head.shape
    du = union_feat.shape[1]
    p = kp["w_cat_h"].shape[1]
    cpad = kp["w_rel"].shape[1]
    grid = (r_pad // tr,)

    row = lambda shape: pl.BlockSpec(shape, lambda i: (i, 0))     # tiled over R
    const = lambda shape: pl.BlockSpec(shape, lambda i: (0, 0))   # VMEM-resident

    weight_elems = 2 * h * h + 2 * h * p + du * p + p * cpad + 2 * h * cpad
    flops = 2 * r_pad * weight_elems
    bytes_accessed = (
        2 * (ec_head.size + ec_tail.size + union_feat.size)  # bf16 activations
        + 4 * fbias.size                                      # f32 freq-bias rows
        + 2 * weight_elems + 4 * (2 * h + 2 * p)              # weights + biases
        + 4 * r_pad * cpad                                    # f32 output
    )

    return pl.pallas_call(
        _rel_fused_kernel,
        grid=grid,
        in_specs=[
            row((tr, h)), row((tr, h)), row((tr, du)), row((tr, cpad)),
            const((h, h)), const((1, h)), const((h, h)), const((1, h)),
            const((h, p)), const((h, p)), const((1, p)),
            const((du, p)), const((1, p)),
            const((p, cpad)),
            const((h, cpad)), const((h, cpad)),
        ],
        out_specs=row((tr, cpad)),
        out_shape=jax.ShapeDtypeStruct((r_pad, cpad), jnp.float32),
        compiler_params=pltpu.CompilerParams(
            dimension_semantics=("parallel",),
            vmem_limit_bytes=48 * 1024 * 1024,
        ),
        cost_estimate=pl.CostEstimate(
            flops=flops, transcendentals=0, bytes_accessed=bytes_accessed),
    )(
        ec_head, ec_tail, union_feat, fbias,
        kp["w_pe_h"], kp["b_pe_h"], kp["w_pe_t"], kp["b_pe_t"],
        kp["w_cat_h"], kp["w_cat_t"], kp["b_cat"],
        kp["w_up"], kp["b_up"],
        kp["w_rel"],
        kp["w_ctx_h"], kp["w_ctx_t"],
    )


# -----------------------------------------------------------------------------
# Parameter construction (torch-equivalent f32) + kernel-ready preparation
# -----------------------------------------------------------------------------
def make_params(key, hidden_dim, pooling_dim, mlp_head_dim,
                num_rel_cls, num_obj_cls):
    ks = jax.random.split(key, 8)

    def xavier(k, fan_in, fan_out):
        limit = (6.0 / (fan_in + fan_out)) ** 0.5
        return jax.random.uniform(k, (fan_in, fan_out), jnp.float32, -limit, limit)

    p = {}
    std = 10.0 * (1.0 / hidden_dim) ** 0.5                      # layer_init(post_emb)
    p["w_post_emb"] = std * jax.random.normal(ks[0], (hidden_dim, 2 * hidden_dim), jnp.float32)
    p["b_post_emb"] = jnp.zeros((2 * hidden_dim,), jnp.float32)
    p["w_post_cat"] = xavier(ks[1], 2 * hidden_dim, pooling_dim)
    p["b_post_cat"] = jnp.zeros((pooling_dim,), jnp.float32)
    p["w_up_dim"] = xavier(ks[2], mlp_head_dim, pooling_dim)
    p["b_up_dim"] = jnp.zeros((pooling_dim,), jnp.float32)
    p["w_rel"] = xavier(ks[3], pooling_dim, num_rel_cls)
    p["b_rel"] = 0.01 * jax.random.normal(ks[4], (num_rel_cls,), jnp.float32)
    p["w_ctx"] = xavier(ks[5], 2 * hidden_dim, num_rel_cls)
    p["b_ctx"] = 0.01 * jax.random.normal(ks[6], (num_rel_cls,), jnp.float32)
    # frequency-bias embedding table [num_obj_cls**2, num_rel_cls]
    p["freq_bias"] = 0.1 * jax.random.normal(
        ks[7], (num_obj_cls * num_obj_cls, num_rel_cls), jnp.float32)
    return p


def prepare_kernel_params(params, hidden_dim, num_rel_cls, lane=128):
    h = hidden_dim
    c = num_rel_cls
    cpad = _round_up(c, lane)
    bf16 = jnp.bfloat16

    def pad_cols(w):
        return jnp.pad(w, ((0, 0), (0, cpad - c)))

    kp = {}
    kp["w_pe_h"] = params["w_post_emb"][:, :h].astype(bf16)
    kp["w_pe_t"] = params["w_post_emb"][:, h:].astype(bf16)
    kp["b_pe_h"] = params["b_post_emb"][:h].reshape(1, h)
    kp["b_pe_t"] = params["b_post_emb"][h:].reshape(1, h)
    kp["w_cat_h"] = params["w_post_cat"][:h].astype(bf16)
    kp["w_cat_t"] = params["w_post_cat"][h:].astype(bf16)
    kp["b_cat"] = params["b_post_cat"].reshape(1, -1)
    kp["w_up"] = params["w_up_dim"].astype(bf16)
    kp["b_up"] = params["b_up_dim"].reshape(1, -1)
    kp["w_rel"] = pad_cols(params["w_rel"]).astype(bf16)
    kp["w_ctx_h"] = pad_cols(params["w_ctx"][:h]).astype(bf16)
    kp["w_ctx_t"] = pad_cols(params["w_ctx"][h:]).astype(bf16)
    # fold rel_compress + ctx_compress biases into the padded freq-bias table
    # so the kernel does a single [TR, Cpad] f32 add per tile.
    fb = params["freq_bias"] + params["b_rel"][None, :] + params["b_ctx"][None, :]
    kp["fb_table"] = pad_cols(fb)          # f32 [num_obj_cls**2, Cpad]
    kp["num_rel_cls"] = c
    return kp


# -----------------------------------------------------------------------------
# Forward (eval mode: predict_use_bias=True, use_vision=True,
#          union_single_not_match=True since pooling_dim != mlp_head_dim)
# -----------------------------------------------------------------------------
def transformer_predictor_forward(kp, hidden_dim, num_obj_cls,
                                  obj_dists, obj_preds, edge_ctx,
                                  rel_pair_idxs, num_objs, num_rels,
                                  union_features):
    # --- global pair indices (glue / index arithmetic) ---
    offsets, off = [], 0
    for n in num_objs:
        offsets.append(off)
        off += n
    gp = jnp.concatenate(
        [idx.astype(jnp.int32) + o for idx, o in zip(rel_pair_idxs, offsets)], axis=0)

    # --- gather small per-relation inputs (XLA gathers on [N,H] tensors) ---
    ec_head = jnp.take(edge_ctx, gp[:, 0], axis=0).astype(jnp.bfloat16)
    ec_tail = jnp.take(edge_ctx, gp[:, 1], axis=0).astype(jnp.bfloat16)
    union_b = union_features.astype(jnp.bfloat16)
    fb_index = obj_preds[gp[:, 0]] * num_obj_cls + obj_preds[gp[:, 1]]
    fbias = jnp.take(kp["fb_table"], fb_index, axis=0)        # [R, Cpad] f32

    # --- pad R to a tile multiple, run the single fused kernel ---
    r = gp.shape[0]
    tr = _pick_row_tile(r)
    r_pad = _round_up(r, tr)
    if r_pad != r:
        pad = ((0, r_pad - r), (0, 0))
        ec_head = jnp.pad(ec_head, pad)
        ec_tail = jnp.pad(ec_tail, pad)
        union_b = jnp.pad(union_b, pad)
        fbias = jnp.pad(fbias, pad)

    rel_full = rel_fused_pallas(ec_head, ec_tail, union_b, fbias, kp, tr)
    rel_dists = rel_full[:r, :kp["num_rel_cls"]]

    # --- split back per image (matches torch .split) ---
    obj_splits, s = [], 0
    for n in num_objs[:-1]:
        s += n
        obj_splits.append(s)
    rel_splits, s = [], 0
    for n in num_rels[:-1]:
        s += n
        rel_splits.append(s)
    obj_dists_list = jnp.split(obj_dists, obj_splits, axis=0)
    rel_dists_list = jnp.split(rel_dists, rel_splits, axis=0)
    add_losses = {}
    return obj_dists_list, rel_dists_list, add_losses, None, None


# -----------------------------------------------------------------------------
# pure-JAX f32 reference (for a sanity check only)
# -----------------------------------------------------------------------------
def reference_rel_dists(params, hidden_dim, num_obj_cls,
                        edge_ctx, obj_preds, gp, union_features):
    edge_rep = edge_ctx @ params["w_post_emb"] + params["b_post_emb"]
    head_rep = edge_rep[:, :hidden_dim]
    tail_rep = edge_rep[:, hidden_dim:]
    prod_rep = jnp.concatenate([head_rep[gp[:, 0]], tail_rep[gp[:, 1]]], axis=-1)
    ctx_gate = prod_rep @ params["w_post_cat"] + params["b_post_cat"]
    visual = ctx_gate * (union_features @ params["w_up_dim"] + params["b_up_dim"])
    rel = (visual @ params["w_rel"] + params["b_rel"]
           + prod_rep @ params["w_ctx"] + params["b_ctx"])
    fb_index = obj_preds[gp[:, 0]] * num_obj_cls + obj_preds[gp[:, 1]]
    return rel + params["freq_bias"][fb_index]


# -----------------------------------------------------------------------------
# Main
# -----------------------------------------------------------------------------
if __name__ == "__main__":
    key = jax.random.PRNGKey(0)

    # small config
    hidden_dim = 32        # CONTEXT_HIDDEN_DIM
    pooling_dim = 128      # CONTEXT_POOLING_DIM
    mlp_head_dim = 64      # ROI_BOX_HEAD.MLP_HEAD_DIM (!= pooling_dim -> up_dim)
    num_rel_cls = 64       # padded to 128 lanes inside the kernel
    num_obj_cls = 16

    num_objs = [8, 8]
    num_rels = [150, 170]  # R=320 -> exercises 256-row tiling + row padding
    n_obj = sum(num_objs)
    n_rel = sum(num_rels)

    k1, k2, k3, k4, k5, k6, k7 = jax.random.split(key, 7)
    edge_ctx = jax.random.normal(k1, (n_obj, hidden_dim), jnp.float32)
    obj_dists = jax.random.normal(k2, (n_obj, num_obj_cls), jnp.float32)
    obj_preds = jax.random.randint(k3, (n_obj,), 0, num_obj_cls, jnp.int32)
    union_features = jax.random.normal(k4, (n_rel, mlp_head_dim), jnp.float32)
    rel_pair_idxs = [
        jax.random.randint(k5, (num_rels[0], 2), 0, num_objs[0], jnp.int32),
        jax.random.randint(k6, (num_rels[1], 2), 0, num_objs[1], jnp.int32),
    ]

    params = make_params(k7, hidden_dim, pooling_dim, mlp_head_dim,
                         num_rel_cls, num_obj_cls)
    kp = prepare_kernel_params(params, hidden_dim, num_rel_cls)

    obj_out, rel_out, add_losses, _, _ = transformer_predictor_forward(
        kp, hidden_dim, num_obj_cls,
        obj_dists, obj_preds, edge_ctx,
        rel_pair_idxs, num_objs, num_rels, union_features)

    rel_cat = jnp.concatenate(rel_out, axis=0)
    jax.block_until_ready(rel_cat)
    for o in obj_out:
        jax.block_until_ready(o)

    assert rel_out[0].shape == (num_rels[0], num_rel_cls)
    assert rel_out[1].shape == (num_rels[1], num_rel_cls)

    # sanity check vs f32 reference (kernel uses bf16 matmul inputs -> loose tol)
    offsets, off = [], 0
    for n in num_objs:
        offsets.append(off)
        off += n
    gp = jnp.concatenate(
        [idx.astype(jnp.int32) + o for idx, o in zip(rel_pair_idxs, offsets)], axis=0)
    ref = reference_rel_dists(params, hidden_dim, num_obj_cls,
                              edge_ctx, obj_preds, gp, union_features)
    err = float(jnp.max(jnp.abs(rel_cat - ref)) / (jnp.max(jnp.abs(ref)) + 1e-6))
    assert err < 0.1, f"relative error too large: {err}"

    print("KERNEL_OK")
</pallas_src>

<mosaic_0001>
module attributes {stable_mosaic.version = 11 : i64} {
  func.func @_rel_fused_kernel(%arg0: i32, %arg1: memref<256x32xbf16, #tpu.memory_space<vmem>>, %arg2: memref<256x32xbf16, #tpu.memory_space<vmem>>, %arg3: memref<256x64xbf16, #tpu.memory_space<vmem>>, %arg4: memref<256x128xf32, #tpu.memory_space<vmem>>, %arg5: memref<32x32xbf16, #tpu.memory_space<vmem>>, %arg6: memref<1x32xf32, #tpu.memory_space<vmem>>, %arg7: memref<32x32xbf16, #tpu.memory_space<vmem>>, %arg8: memref<1x32xf32, #tpu.memory_space<vmem>>, %arg9: memref<32x128xbf16, #tpu.memory_space<vmem>>, %arg10: memref<32x128xbf16, #tpu.memory_space<vmem>>, %arg11: memref<1x128xf32, #tpu.memory_space<vmem>>, %arg12: memref<64x128xbf16, #tpu.memory_space<vmem>>, %arg13: memref<1x128xf32, #tpu.memory_space<vmem>>, %arg14: memref<128x128xbf16, #tpu.memory_space<vmem>>, %arg15: memref<32x128xbf16, #tpu.memory_space<vmem>>, %arg16: memref<32x128xbf16, #tpu.memory_space<vmem>>, %arg17: memref<256x128xf32, #tpu.memory_space<vmem>>) attributes {dimension_semantics = [#tpu.dimension_semantics<parallel>], iteration_bounds = array<i64: 2>, scalar_prefetch = 0 : i64, scratch_operands = 0 : i64, tpu.core_type = #tpu.core_type<tc>, window_params = [{transform_indices = @transform_0, window_bounds = array<i64: 256, 32>}, {transform_indices = @transform_1, window_bounds = array<i64: 256, 32>}, {transform_indices = @transform_2, window_bounds = array<i64: 256, 64>}, {transform_indices = @transform_3, window_bounds = array<i64: 256, 128>}, {pipeline_mode = #tpu.pipeline_mode<synchronous>, transform_indices = @transform_4, window_bounds = array<i64: 32, 32>}, {pipeline_mode = #tpu.pipeline_mode<synchronous>, transform_indices = @transform_5, window_bounds = array<i64: 1, 32>}, {pipeline_mode = #tpu.pipeline_mode<synchronous>, transform_indices = @transform_6, window_bounds = array<i64: 32, 32>}, {pipeline_mode = #tpu.pipeline_mode<synchronous>, transform_indices = @transform_7, window_bounds = array<i64: 1, 32>}, {pipeline_mode = #tpu.pipeline_mode<synchronous>, transform_indices = @transform_8, window_bounds = array<i64: 32, 128>}, {pipeline_mode = #tpu.pipeline_mode<synchronous>, transform_indices = @transform_9, window_bounds = array<i64: 32, 128>}, {pipeline_mode = #tpu.pipeline_mode<synchronous>, transform_indices = @transform_10, window_bounds = array<i64: 1, 128>}, {pipeline_mode = #tpu.pipeline_mode<synchronous>, transform_indices = @transform_11, window_bounds = array<i64: 64, 128>}, {pipeline_mode = #tpu.pipeline_mode<synchronous>, transform_indices = @transform_12, window_bounds = array<i64: 1, 128>}, {pipeline_mode = #tpu.pipeline_mode<synchronous>, transform_indices = @transform_13, window_bounds = array<i64: 128, 128>}, {pipeline_mode = #tpu.pipeline_mode<synchronous>, transform_indices = @transform_14, window_bounds = array<i64: 32, 128>}, {pipeline_mode = #tpu.pipeline_mode<synchronous>, transform_indices = @transform_15, window_bounds = array<i64: 32, 128>}, {transform_indices = @transform_16, window_bounds = array<i64: 256, 128>}]} {
    %c0 = arith.constant 0 : index
    %c0_0 = arith.constant 0 : index
    %0 = vector.load %arg1[%c0, %c0_0] : memref<256x32xbf16, #tpu.memory_space<vmem>>, vector<256x32xbf16>
    %c0_1 = arith.constant 0 : index
    %c0_2 = arith.constant 0 : index
    %1 = vector.load %arg5[%c0_1, %c0_2] : memref<32x32xbf16, #tpu.memory_space<vmem>>, vector<32x32xbf16>
    %cst = arith.constant dense<0.000000e+00> : vector<256x32xf32>
    %2 = tpu.matmul %0, %1, %cst {dimension_numbers = #tpu.dot_dimension_numbers<[1], [0], [0], [1], [0, 0, 1, 1], [], []>} : vector<256x32xbf16>, vector<32x32xbf16>, vector<256x32xf32> -> vector<256x32xf32>
    %c0_3 = arith.constant 0 : index
    %c0_4 = arith.constant 0 : index
    %3 = vector.load %arg6[%c0_3, %c0_4] : memref<1x32xf32, #tpu.memory_space<vmem>>, vector<1x32xf32>
    %4 = vector.broadcast %3 : vector<1x32xf32> to vector<256x32xf32>
    %5 = arith.addf %2, %4 : vector<256x32xf32>
    %c0_5 = arith.constant 0 : index
    %c0_6 = arith.constant 0 : index
    %6 = vector.load %arg2[%c0_5, %c0_6] : memref<256x32xbf16, #tpu.memory_space<vmem>>, vector<256x32xbf16>
    %c0_7 = arith.constant 0 : index
    %c0_8 = arith.constant 0 : index
    %7 = vector.load %arg7[%c0_7, %c0_8] : memref<32x32xbf16, #tpu.memory_space<vmem>>, vector<32x32xbf16>
    %cst_9 = arith.constant dense<0.000000e+00> : vector<256x32xf32>
    %8 = tpu.matmul %6, %7, %cst_9 {dimension_numbers = #tpu.dot_dimension_numbers<[1], [0], [0], [1], [0, 0, 1, 1], [], []>} : vector<256x32xbf16>, vector<32x32xbf16>, vector<256x32xf32> -> vector<256x32xf32>
    %c0_10 = arith.constant 0 : index
    %c0_11 = arith.constant 0 : index
    %9 = vector.load %arg8[%c0_10, %c0_11] : memref<1x32xf32, #tpu.memory_space<vmem>>, vector<1x32xf32>
    %10 = vector.broadcast %9 : vector<1x32xf32> to vector<256x32xf32>
    %11 = arith.addf %8, %10 : vector<256x32xf32>
    %12 = arith.truncf %5 : vector<256x32xf32> to vector<256x32xbf16>
    %13 = arith.truncf %11 : vector<256x32xf32> to vector<256x32xbf16>
    %c0_12 = arith.constant 0 : index
    %c0_13 = arith.constant 0 : index
    %14 = vector.load %arg9[%c0_12, %c0_13] : memref<32x128xbf16, #tpu.memory_space<vmem>>, vector<32x128xbf16>
    %cst_14 = arith.constant dense<0.000000e+00> : vector<256x128xf32>
    %15 = tpu.matmul %12, %14, %cst_14 {dimension_numbers = #tpu.dot_dimension_numbers<[1], [0], [0], [1], [0, 0, 1, 1], [], []>} : vector<256x32xbf16>, vector<32x128xbf16>, vector<256x128xf32> -> vector<256x128xf32>
    %c0_15 = arith.constant 0 : index
    %c0_16 = arith.constant 0 : index
    %16 = vector.load %arg10[%c0_15, %c0_16] : memref<32x128xbf16, #tpu.memory_space<vmem>>, vector<32x128xbf16>
    %cst_17 = arith.constant dense<0.000000e+00> : vector<256x128xf32>
    %17 = tpu.matmul %13, %16, %cst_17 {dimension_numbers = #tpu.dot_dimension_numbers<[1], [0], [0], [1], [0, 0, 1, 1], [], []>} : vector<256x32xbf16>, vector<32x128xbf16>, vector<256x128xf32> -> vector<256x128xf32>
    %18 = arith.addf %15, %17 : vector<256x128xf32>
    %c0_18 = arith.constant 0 : index
    %c0_19 = arith.constant 0 : index
    %19 = vector.load %arg11[%c0_18, %c0_19] : memref<1x128xf32, #tpu.memory_space<vmem>>, vector<1x128xf32>
    %20 = vector.broadcast %19 : vector<1x128xf32> to vector<256x128xf32>
    %21 = arith.addf %18, %20 : vector<256x128xf32>
    %c0_20 = arith.constant 0 : index
    %c0_21 = arith.constant 0 : index
    %22 = vector.load %arg3[%c0_20, %c0_21] : memref<256x64xbf16, #tpu.memory_space<vmem>>, vector<256x64xbf16>
    %c0_22 = arith.constant 0 : index
    %c0_23 = arith.constant 0 : index
    %23 = vector.load %arg12[%c0_22, %c0_23] : memref<64x128xbf16, #tpu.memory_space<vmem>>, vector<64x128xbf16>
    %cst_24 = arith.constant dense<0.000000e+00> : vector<256x128xf32>
    %24 = tpu.matmul %22, %23, %cst_24 {dimension_numbers = #tpu.dot_dimension_numbers<[1], [0], [0], [1], [0, 0, 1, 1], [], []>} : vector<256x64xbf16>, vector<64x128xbf16>, vector<256x128xf32> -> vector<256x128xf32>
    %c0_25 = arith.constant 0 : index
    %c0_26 = arith.constant 0 : index
    %25 = vector.load %arg13[%c0_25, %c0_26] : memref<1x128xf32, #tpu.memory_space<vmem>>, vector<1x128xf32>
    %26 = vector.broadcast %25 : vector<1x128xf32> to vector<256x128xf32>
    %27 = arith.addf %24, %26 : vector<256x128xf32>
    %28 = arith.mulf %21, %27 : vector<256x128xf32>
    %29 = arith.truncf %28 : vector<256x128xf32> to vector<256x128xbf16>
    %c0_27 = arith.constant 0 : index
    %c0_28 = arith.constant 0 : index
    %30 = vector.load %arg14[%c0_27, %c0_28] : memref<128x128xbf16, #tpu.memory_space<vmem>>, vector<128x128xbf16>
    %cst_29 = arith.constant dense<0.000000e+00> : vector<256x128xf32>
    %31 = tpu.matmul %29, %30, %cst_29 {dimension_numbers = #tpu.dot_dimension_numbers<[1], [0], [0], [1], [0, 0, 1, 1], [], []>} : vector<256x128xbf16>, vector<128x128xbf16>, vector<256x128xf32> -> vector<256x128xf32>
    %c0_30 = arith.constant 0 : index
    %c0_31 = arith.constant 0 : index
    %32 = vector.load %arg15[%c0_30, %c0_31] : memref<32x128xbf16, #tpu.memory_space<vmem>>, vector<32x128xbf16>
    %cst_32 = arith.constant dense<0.000000e+00> : vector<256x128xf32>
    %33 = tpu.matmul %12, %32, %cst_32 {dimension_numbers = #tpu.dot_dimension_numbers<[1], [0], [0], [1], [0, 0, 1, 1], [], []>} : vector<256x32xbf16>, vector<32x128xbf16>, vector<256x128xf32> -> vector<256x128xf32>
    %c0_33 = arith.constant 0 : index
    %c0_34 = arith.constant 0 : index
    %34 = vector.load %arg16[%c0_33, %c0_34] : memref<32x128xbf16, #tpu.memory_space<vmem>>, vector<32x128xbf16>
    %cst_35 = arith.constant dense<0.000000e+00> : vector<256x128xf32>
    %35 = tpu.matmul %13, %34, %cst_35 {dimension_numbers = #tpu.dot_dimension_numbers<[1], [0], [0], [1], [0, 0, 1, 1], [], []>} : vector<256x32xbf16>, vector<32x128xbf16>, vector<256x128xf32> -> vector<256x128xf32>
    %36 = arith.addf %33, %35 : vector<256x128xf32>
    %37 = arith.addf %31, %36 : vector<256x128xf32>
    %c0_36 = arith.constant 0 : index
    %c0_37 = arith.constant 0 : index
    %38 = vector.load %arg4[%c0_36, %c0_37] : memref<256x128xf32, #tpu.memory_space<vmem>>, vector<256x128xf32>
    %39 = arith.addf %37, %38 : vector<256x128xf32>
    %c0_38 = arith.constant 0 : index
    %c0_39 = arith.constant 0 : index
    %40 = vector.load %arg17[%c0_38, %c0_39] : memref<256x128xf32, #tpu.memory_space<vmem>>, vector<256x128xf32>
    tpu.vector_store %arg17[%c0_38, %c0_39], %39 {strides = array<i32>} : memref<256x128xf32, #tpu.memory_space<vmem>>, vector<256x128xf32>,
    return
  }
  func.func @transform_0(%arg0: i32) -> (i32, i32) {
    %c0_i32 = arith.constant 0 : i32
    %c0_i32_0 = arith.constant 0 : i32
    return %arg0, %c0_i32 : i32, i32
  }
  func.func @transform_1(%arg0: i32) -> (i32, i32) {
    %c0_i32 = arith.constant 0 : i32
    %c0_i32_0 = arith.constant 0 : i32
    return %arg0, %c0_i32 : i32, i32
  }
  func.func @transform_2(%arg0: i32) -> (i32, i32) {
    %c0_i32 = arith.constant 0 : i32
    %c0_i32_0 = arith.constant 0 : i32
    return %arg0, %c0_i32 : i32, i32
  }
  func.func @transform_3(%arg0: i32) -> (i32, i32) {
    %c0_i32 = arith.constant 0 : i32
    %c0_i32_0 = arith.constant 0 : i32
    return %arg0, %c0_i32 : i32, i32
  }
  func.func @transform_4(%arg0: i32) -> (i32, i32) {
    %c0_i32 = arith.constant 0 : i32
    %c0_i32_0 = arith.constant 0 : i32
    %c0_i32_1 = arith.constant 0 : i32
    return %c0_i32, %c0_i32_0 : i32, i32
  }
  func.func @transform_5(%arg0: i32) -> (i32, i32) {
    %c0_i32 = arith.constant 0 : i32
    %c0_i32_0 = arith.constant 0 : i32
    %c0_i32_1 = arith.constant 0 : i32
    return %c0_i32, %c0_i32_0 : i32, i32
  }
  func.func @transform_6(%arg0: i32) -> (i32, i32) {
    %c0_i32 = arith.constant 0 : i32
    %c0_i32_0 = arith.constant 0 : i32
    %c0_i32_1 = arith.constant 0 : i32
    return %c0_i32, %c0_i32_0 : i32, i32
  }
  func.func @transform_7(%arg0: i32) -> (i32, i32) {
    %c0_i32 = arith.constant 0 : i32
    %c0_i32_0 = arith.constant 0 : i32
    %c0_i32_1 = arith.constant 0 : i32
    return %c0_i32, %c0_i32_0 : i32, i32
  }
  func.func @transform_8(%arg0: i32) -> (i32, i32) {
    %c0_i32 = arith.constant 0 : i32
    %c0_i32_0 = arith.constant 0 : i32
    %c0_i32_1 = arith.constant 0 : i32
    return %c0_i32, %c0_i32_0 : i32, i32
  }
  func.func @transform_9(%arg0: i32) -> (i32, i32) {
    %c0_i32 = arith.constant 0 : i32
    %c0_i32_0 = arith.constant 0 : i32
    %c0_i32_1 = arith.constant 0 : i32
    return %c0_i32, %c0_i32_0 : i32, i32
  }
  func.func @transform_10(%arg0: i32) -> (i32, i32) {
    %c0_i32 = arith.constant 0 : i32
    %c0_i32_0 = arith.constant 0 : i32
    %c0_i32_1 = arith.constant 0 : i32
    return %c0_i32, %c0_i32_0 : i32, i32
  }
  func.func @transform_11(%arg0: i32) -> (i32, i32) {
    %c0_i32 = arith.constant 0 : i32
    %c0_i32_0 = arith.constant 0 : i32
    %c0_i32_1 = arith.constant 0 : i32
    return %c0_i32, %c0_i32_0 : i32, i32
  }
  func.func @transform_12(%arg0: i32) -> (i32, i32) {
    %c0_i32 = arith.constant 0 : i32
    %c0_i32_0 = arith.constant 0 : i32
    %c0_i32_1 = arith.constant 0 : i32
    return %c0_i32, %c0_i32_0 : i32, i32
  }
  func.func @transform_13(%arg0: i32) -> (i32, i32) {
    %c0_i32 = arith.constant 0 : i32
    %c0_i32_0 = arith.constant 0 : i32
    %c0_i32_1 = arith.constant 0 : i32
    return %c0_i32, %c0_i32_0 : i32, i32
  }
  func.func @transform_14(%arg0: i32) -> (i32, i32) {
    %c0_i32 = arith.constant 0 : i32
    %c0_i32_0 = arith.constant 0 : i32
    %c0_i32_1 = arith.constant 0 : i32
    return %c0_i32, %c0_i32_0 : i32, i32
  }
  func.func @transform_15(%arg0: i32) -> (i32, i32) {
    %c0_i32 = arith.constant 0 : i32
    %c0_i32_0 = arith.constant 0 : i32
    %c0_i32_1 = arith.constant 0 : i32
    return %c0_i32, %c0_i32_0 : i32, i32
  }
  func.func @transform_16(%arg0: i32) -> (i32, i32) {
    %c0_i32 = arith.constant 0 : i32
    %c0_i32_0 = arith.constant 0 : i32
    return %arg0, %c0_i32 : i32, i32
  }
}

</mosaic_0001>

<bundles_post_ra>
// kernel: tpu_custom_call.1
= control target key start
LH: loop header
LB: loop body
LE: loop exit
PB: predicated region body
PF: predicated region fallthrough
CT: control target
= control target key end

     0   :  { %s4902_s0 = inlined_call_operand.vmem [shape: bf16[512,32], index: 0, kind: input, shape index: {}]   ;;  %s4903_s1 = inlined_call_operand.vmem [shape: bf16[512,32], index: 1, kind: input, shape index: {}]   ;;  %s4904_s2 = inlined_call_operand.vmem [shape: bf16[512,64], index: 2, kind: input, shape index: {}]   ;;  %s4905_s3 = inlined_call_operand.vmem [shape: f32[512,128], index: 3, kind: input, shape index: {}]   ;;  %s4906_s4 = inlined_call_operand.vmem [shape: bf16[32,32], index: 4, kind: input, shape index: {}]   ;;  %s4907_s5 = inlined_call_operand.vmem [shape: f32[1,32], index: 5, kind: input, shape index: {}]   ;;  %s4908_s6 = inlined_call_operand.vmem [shape: bf16[32,32], index: 6, kind: input, shape index: {}]   ;;  %s4909_s7 = inlined_call_operand.vmem [shape: f32[1,32], index: 7, kind: input, shape index: {}]   ;;  %s4910_s8 = inlined_call_operand.vmem [shape: bf16[32,128], index: 8, kind: input, shape index: {}]   ;;  %s4911_s9 = inlined_call_operand.vmem [shape: bf16[32,128], index: 9, kind: input, shape index: {}]   ;;  %s4912_s10 = inlined_call_operand.vmem [shape: f32[1,128], index: 10, kind: input, shape index: {}]   ;;  %s4913_s11 = inlined_call_operand.vmem [shape: bf16[64,128], index: 11, kind: input, shape index: {}]   ;;  %s4914_s12 = inlined_call_operand.vmem [shape: f32[1,128], index: 12, kind: input, shape index: {}]   ;;  %s4915_s13 = inlined_call_operand.vmem [shape: bf16[128,128], index: 13, kind: input, shape index: {}]   ;;  %s4916_s14 = inlined_call_operand.vmem [shape: bf16[32,128], index: 14, kind: input, shape index: {}]   ;;  %s4917_s15 = inlined_call_operand.vmem [shape: bf16[32,128], index: 15, kind: input, shape index: {}]   ;;  %s4918_s16 = inlined_call_operand.hbm [shape: f32[512,128], index: 16, kind: output, shape index: {}]  }
   0x1   :  { %4922 = sst [smem:[#allocation10_spill]] %s4902_s0 }
   0x2   :  { %4923 = sst [smem:[#allocation11_spill]] %s4906_s4 }
   0x3   :  { %4924 = sst [smem:[#allocation12_spill]] %s4908_s6 }
   0x4   :  { %21 = vsyncpa [#allocation3], 0 }
   0x5   :  { %23 = vsyncpa [#allocation3 + $0x1], 0  ;;  %s3922_s21 = smov 0   ;;  %s3924_s22 = smov 0  }
   0x6   :  { %s3926_s23 = smov 0   ;;  %s3928_s24 = smov 0  }
   0x7 LB: > { %4925 = sst [smem:[#allocation5_spill]] %s3828_s23  ;;  %s3943_s25 = sadd.s32 4294967295, %s3832_s24   ;;  %s3832_s24 = sphi %s3928_s24, %s4937_s24   ;;  %s3828_s23 = sphi %s3926_s23, %s4942_s23   ;;  %s3824_s22 = sphi %s3924_s22, %s4941_s22   ;;  %s3820_s21 = sphi %s3922_s21, %s4940_s21  }
   0x8   : > { %s2996_s26 = sadd.s32 4294967294, %s3832_s24   ;;  %s3947_s27 = sadd.s32 1, %s3832_s24  }
   0x9   : > { %4926 = sst [smem:[#allocation6_spill]] %s3947_s27  ;;  %s392_s28 = sadd.s32 1, %s3828_s23 }
   0xa   : > { %s389_s29 = ssub.s32 %s3832_s24, %s3947_s27  ;;  %p402_p0 = scmp.ne.s32.totalorder %s3828_s23, %s3824_s22 }
   0xb   : > { %p390_p1 = scmp.eq.s32.totalorder %s389_s29, 0  ;;  %p403_p2 = scmp.eq.s32.totalorder %s3943_s25, 1 }
   0xc   : > { %p408_p3 = scmp.ne.s32.totalorder %s3824_s22, %s3820_s21  ;;  %p409_p4 = scmp.eq.s32.totalorder %s2996_s26, 1 }
   0xd   : > { %s3958_s30 = scalar_select %p390_p1, %s3828_s23, %s392_s28  }
   0xe   : > { %p3960_p5 = por %p403_p2, %p402_p0  ;;  %p3964_p6 = por %p409_p4, %p408_p3 }
   0xf   : > { %4927 = sst [smem:[#allocation7_spill]] %s3958_s30  ;;  %p2999_p7 = scmp.ge.s32.totalorder %s3832_s24, 1 }
  0x10   : > { %p499_p8 = scmp.lt.s32.totalorder %s3832_s24, 3 }
  0x12   : > { %p500_p9 = pnand %p2999_p7, %p499_p8 }
  0x14   : > { %503 = sbr.rel (%p500_p9) target bundleno = 788 (0x314), region = 84 }
  0x19   : > { %s4930_s4 = sld [smem:[#allocation11_spill]]  ;;  %s3001_s20 = sshll.u32 %s3943_s25, 5  ;;  %v3736_v4 = vld [vmem:[%s4911_s9 + $0x8] sm:$0xff]   ;;  %vm725_vm0 = vcmask 261120   ;;  %v3737_v6 = vld [vmem:[%s4911_s9] sm:$0xff]   ;;  %v3740_v40 = vld [vmem:[%s4913_s11 + $0x18] sm:$0xff]  }
  0x1a   : > { %s4931_s6 = sld [smem:[#allocation12_spill]]  ;;  %p565_p10 = scmp.lt.s32.totalorder %s3001_s20, 63  ;;  %v3738_v38 = vld [vmem:[%s4910_s8 + $0x8] sm:$0xff]   ;;  %v3739_v39 = vld [vmem:[%s4910_s8] sm:$0xff]   ;;  %vm1951_vm1 = vcmask 523264  }
  0x1b   : > { %s4932_s29 = sld [smem:[#allocation10_spill]]  ;;  %v3744_v41 = vld [vmem:[%s4917_s15 + $0x8] sm:$0xff]   ;;  %v4091_v43 = vld [vmem:[%s4907_s5] ss:$0 sm:$0xff]  ;;  %s561_s30 = sand.u32 1, %s3824_s22  }
  0x1c   : > { %s4944_s20 = smov (!%p565_p10, %s3001_s20), 63  ;;  %v4099_v52 = vld [vmem:[%s4909_s7] ss:$0 sm:$0xff]  ;;  %s3202_s27 = sshll.u32 %s3943_s25, 12 }
  0x1d   : > { %s3989_s26 = sshll.u32 %s4944_s20, 2  ;;  %s4862_s25 = scalar_lea.sflag [#allocation3], %s561_s30 }
  0x1e   : > { %s4002_s18 = scalar_lea.vmem %s4903_s1, %s3989_s26  ;;  %s4050_s28 = scalar_lea.vmem %s4904_s2, %s3989_s26 }
  0x1f   : > { %v3700_v0 = vld [vmem:[%s4930_s4 + $0x8] sm:$0xff]   ;;  %v3702_v2 = vld [vmem:[%s4930_s4] sm:$0xff]   ;;  %v3709_v11 = vld [vmem:[%s4002_s18 + $0x10] sm:$0xff]  }
  0x20   : > { %v3701_v1 = vld [vmem:[%s4931_s6 + $0x8] sm:$0xff]   ;;  %3355 = vmatprep.subr.bf16.mxu0 %v3700_v0  ;;  %v3703_v3 = vld [vmem:[%s4931_s6] sm:$0xff]   ;;  %v3711_v13 = vld [vmem:[%s4002_s18 + $0x18] sm:$0xff]  }
  0x21   : > { %3391 = vmatprep.subr.bf16.mxu1 %v3701_v1  ;;  %3356 = vmatpush3.bf16.msra.mxu0 %v3700_v0  ;;  %s3995_s4 = scalar_lea.vmem %s4932_s29, %s3989_s26  ;;  %v3705_v7 = vld [vmem:[%s4002_s18] sm:$0xff]   ;;  %v3707_v9 = vld [vmem:[%s4002_s18 + $0x8] sm:$0xff]   ;;  %v3717_v19 = vld [vmem:[%s4002_s18 + $0x30] sm:$0xff]   ;;  %s3834_s29 = smov [#allocation2]  }
  0x22   : > { %3392 = vmatpush3.bf16.msra.mxu1 %v3701_v1  ;;  %3357 = vmatprep.subr.bf16.mxu0 %v3702_v2  ;;  %v3704_v5 = vld [vmem:[%s3995_s4] sm:$0xff]   ;;  %v3706_v8 = vld [vmem:[%s3995_s4 + $0x8] sm:$0xff]   ;;  %v3708_v10 = vld [vmem:[%s3995_s4 + $0x10] sm:$0xff]  }
  0x23   : > { %3393 = vmatprep.subr.bf16.mxu1 %v3703_v3  ;;  %3359 = vmatprep.mubr.msk.bf16.mxu0 %vm725_vm0, %v3704_v5  ;;  %v3710_v12 = vld [vmem:[%s3995_s4 + $0x18] sm:$0xff]   ;;  %v3712_v14 = vld [vmem:[%s3995_s4 + $0x20] sm:$0xff]   ;;  %v3714_v16 = vld [vmem:[%s3995_s4 + $0x28] sm:$0xff]  }
  0x24   : > { %3395 = vmatprep.mubr.msk.bf16.mxu1 %vm725_vm0, %v3705_v7  ;;  %v3713_v15 = vld [vmem:[%s4002_s18 + $0x20] sm:$0xff]   ;;  %v3715_v17 = vld [vmem:[%s4002_s18 + $0x28] sm:$0xff]   ;;  %v3716_v18 = vld [vmem:[%s3995_s4 + $0x30] sm:$0xff]  }
  0x25   : > { %3358 = vmatpush3.bf16.msra.mxu0 %v3702_v2  ;;  %v3718_v20 = vld [vmem:[%s3995_s4 + $0x38] sm:$0xff]   ;;  %v3720_v22 = vld [vmem:[%s3995_s4 + $0x40] sm:$0xff]   ;;  %v3722_v24 = vld [vmem:[%s3995_s4 + $0x48] sm:$0xff]  }
  0x26   : > { %3394 = vmatpush3.bf16.msra.mxu1 %v3703_v3  ;;  %3427 = vmatprep.subr.bf16.mxu0 %v3736_v4  ;;  %v3719_v21 = vld [vmem:[%s4002_s18 + $0x38] sm:$0xff]   ;;  %v3721_v23 = vld [vmem:[%s4002_s18 + $0x40] sm:$0xff]   ;;  %v3723_v25 = vld [vmem:[%s4002_s18 + $0x48] sm:$0xff]  }
  0x27   : > { %v3724_v26 = vld [vmem:[%s3995_s4 + $0x50] sm:$0xff]   ;;  %v3726_v28 = vld [vmem:[%s3995_s4 + $0x58] sm:$0xff]   ;;  %v3728_v30 = vld [vmem:[%s3995_s4 + $0x60] sm:$0xff]   ;;  %3463 = vmatprep.subr.bf16.mxu1 %v3738_v38 }
  0x28   : > { %3360 = vmatmul.mubr.msk.bf16.vlgmr.msra.gmra.mxu0 %vm725_vm0, %v3706_v8  ;;  %v3725_v27 = vld [vmem:[%s4002_s18 + $0x50] sm:$0xff]   ;;  %v3727_v29 = vld [vmem:[%s4002_s18 + $0x58] sm:$0xff]   ;;  %v3729_v31 = vld [vmem:[%s4002_s18 + $0x60] sm:$0xff]  }
  0x29   : > { %3396 = vmatmul.mubr.msk.bf16.vlgmr.msra.gmra.mxu1 %vm725_vm0, %v3707_v9  ;;  %3428 = vmatpush3.bf16.msra.mxu0 %v3736_v4  ;;  %v3730_v32 = vld [vmem:[%s3995_s4 + $0x68] sm:$0xff]   ;;  %v3732_v34 = vld [vmem:[%s3995_s4 + $0x70] sm:$0xff]   ;;  %v3734_v36 = vld [vmem:[%s3995_s4 + $0x78] sm:$0xff]  }
  0x2a   : > { %3363 = vmatprep.mubr.msk.bf16.mxu0 %vm725_vm0, %v3708_v10  ;;  %3429 = vmatprep.subr.bf16.mxu0 %v3737_v6  ;;  %v3731_v33 = vld [vmem:[%s4002_s18 + $0x68] sm:$0xff]   ;;  %v3733_v35 = vld [vmem:[%s4002_s18 + $0x70] sm:$0xff]   ;;  %v3735_v37 = vld [vmem:[%s4002_s18 + $0x78] sm:$0xff]   ;;  %s3008_s18 = sshll.u32 %s4944_s20, 3  ;;  %s3000_s20 = sshll.u32 %s561_s30, 8 }
  0x2b   : > { %3399 = vmatprep.mubr.msk.bf16.mxu1 %vm725_vm0, %v3709_v11  ;;  %3464 = vmatpush3.bf16.msra.mxu1 %v3738_v38  ;;  %v3745_v2 = vld [vmem:[%s4917_s15] sm:$0xff]   ;;  %v3741_v5 = vld [vmem:[%s4913_s11 + $0x10] sm:$0xff]   ;;  %s4734_s23 = scalar_lea.vmem [#allocation2], %s3000_s20 }
  0x2c   : > { %3465 = vmatprep.subr.bf16.mxu1 %v3739_v39  ;;  %s2898_s19 = sshll.u32 %s4734_s23, 4  ;;  %s4856_s19 = int_to_ptr.vmem [resolvable:$true] %s2898_s19 }
  0x2d   : > { %3430 = vmatpush3.bf16.msra.mxu0 %v3737_v6  ;;  %s3772_s26 = scalar_lea.vmem %s4856_s19, 4096 }
  0x2e   : > { %3499 = vmatprep.subr.bf16.mxu0 %v3740_v40  ;;  %p3773_p11 = scmp.ne.s32.totalorder %s4856_s19, %s3772_s26 }
  0x2f   : > { %3466 = vmatpush3.bf16.msra.mxu1 %v3739_v39 }
  0x30   : > { %3364 = vmatmul.mubr.msk.bf16.gmra.mxu0 %vm725_vm0, %v3710_v12  ;;  %3539 = vmatprep.subr.bf16.mxu1 %v3744_v41  ;;  %p3774_p12 = pnand %p3773_p11, %p3960_p5 }
  0x31   : > { %3400 = vmatmul.mubr.msk.bf16.gmra.mxu1 %vm725_vm0, %v3711_v13  ;;  %3367 = vmatprep.mubr.msk.bf16.mxu0 %vm725_vm0, %v3712_v14 }
  0x32   : > { %3403 = vmatprep.mubr.msk.bf16.mxu1 %vm725_vm0, %v3713_v15  ;;  %v3742_v15 = vld [vmem:[%s4913_s11 + $0x8] sm:$0xff]   ;;  %p3775_p13 = pneg %p3774_p12 }
  0x38   : > { %3368 = vmatmul.mubr.msk.bf16.gmra.mxu0 %vm725_vm0, %v3714_v16 }
  0x39   : > { %3404 = vmatmul.mubr.msk.bf16.gmra.mxu1 %vm725_vm0, %v3715_v17  ;;  %3371 = vmatprep.mubr.msk.bf16.mxu0 %vm725_vm0, %v3716_v18 }
  0x3a   : > { %3407 = vmatprep.mubr.msk.bf16.mxu1 %vm725_vm0, %v3717_v19 }
  0x40   : > { %3372 = vmatmul.mubr.msk.bf16.gmra.mxu0 %vm725_vm0, %v3718_v20 }
  0x41   : > { %3408 = vmatmul.mubr.msk.bf16.gmra.mxu1 %vm725_vm0, %v3719_v21  ;;  %3375 = vmatprep.mubr.msk.bf16.mxu0 %vm725_vm0, %v3720_v22 }
  0x42   : > { %3411 = vmatprep.mubr.msk.bf16.mxu1 %vm725_vm0, %v3721_v23 }
  0x48   : > { %3376 = vmatmul.mubr.msk.bf16.gmra.mxu0 %vm725_vm0, %v3722_v24 }
  0x49   : > { %3412 = vmatmul.mubr.msk.bf16.gmra.mxu1 %vm725_vm0, %v3723_v25  ;;  %3379 = vmatprep.mubr.msk.bf16.mxu0 %vm725_vm0, %v3724_v26 }
  0x4a   : > { %3415 = vmatprep.mubr.msk.bf16.mxu1 %vm725_vm0, %v3725_v27  ;;  %v3743_v27 = vld [vmem:[%s4913_s11] sm:$0xff]  }
  0x50   : > { %3380 = vmatmul.mubr.msk.bf16.gmra.mxu0 %vm725_vm0, %v3726_v28 }
  0x51   : > { %3416 = vmatmul.mubr.msk.bf16.gmra.mxu1 %vm725_vm0, %v3727_v29  ;;  %3383 = vmatprep.mubr.msk.bf16.mxu0 %vm725_vm0, %v3728_v30 }
  0x52   : > { %3419 = vmatprep.mubr.msk.bf16.mxu1 %vm725_vm0, %v3729_v31 }
  0x58   : > { %3384 = vmatmul.mubr.msk.bf16.gmra.mxu0 %vm725_vm0, %v3730_v32 }
  0x59   : > { %3420 = vmatmul.mubr.msk.bf16.gmra.mxu1 %vm725_vm0, %v3731_v33  ;;  %3387 = vmatprep.mubr.msk.bf16.mxu0 %vm725_vm0, %v3732_v34 }
  0x5a   : > { %3423 = vmatprep.mubr.msk.bf16.mxu1 %vm725_vm0, %v3733_v35 }
  0x60   : > { %3388 = vmatmul.mubr.msk.bf16.gmra.mxu0 %vm725_vm0, %v3734_v36 }
  0x61   : > { %3424 = vmatmul.mubr.msk.bf16.gmra.mxu1 %vm725_vm0, %v3735_v37  ;;  %v4166_v37 = vld [vmem:[%s4916_s14 + $0x8] sm:$0xff]  }
  0xe8   : > { %v3361_v42 = vpop.f32.mrf.mxu0 }
  0xe9   : > { %v3397_v44 = vpop.f32.mrf.mxu1  ;;  %v817_v47 = vadd.f32 %v3361_v42, %v4091_v43 }
  0xea   : > { %v808_v45 = vpop.f32.mrf.mxu0  ;;  %v1161_v61 = vadd.f32 %v3397_v44, %v4099_v52 }
  0xeb   : > { %v1152_v46 = vpop.f32.mrf.mxu1  ;;  %v809_v49 = vadd.f32 %v4091_v43, %v808_v45 }
  0xec   : > { %v3362_v48 = vpop.f32.mrf.mxu0  ;;  %v1153_v57 = vadd.f32 %v4099_v52, %v1152_v46 }
  0xed   : > { %v820_v50 = vadd.f32 %v3362_v48, %v4091_v43  ;;  %v3398_v51 = vpop.f32.mrf.mxu1 }
  0xee   : > { %v811_v53 = vpop.f32.mrf.mxu0  ;;  %v1164_v54 = vadd.f32 %v3398_v51, %v4099_v52 }
  0xef   : > { %v812_v55 = vadd.f32 %v4091_v43, %v811_v53  ;;  %v1155_v56 = vpop.f32.mrf.mxu1  ;;  %v4104_v58 = vpack.c.bf16 %v820_v50, %v817_v47 }
  0xf0   : > { %v1156_v59 = vadd.f32 %v4099_v52, %v1155_v56  ;;  %v3365_v60 = vpop.f32.mrf.mxu0  ;;  %v4115_v3 = vpack.c.bf16 %v1164_v54, %v1161_v61 }
  0xf1   : > { %v4108_v62 = vpack.c.bf16 %v812_v55, %v809_v49  ;;  %v3401_v63 = vpop.f32.mrf.mxu1  ;;  %v833_v6 = vadd.f32 %v3365_v60, %v4091_v43 }
  0xf2   : > { %v4110_v0 = vpack.c.bf16 %v1156_v59, %v1153_v57  ;;  %v824_v1 = vpop.f32.mrf.mxu0  ;;  %v1177_v20 = vadd.f32 %v3401_v63, %v4099_v52 }
  0xf3   : > { %v1168_v4 = vpop.f32.mrf.mxu1  ;;  %3467 = vmatprep.mubr.msk.bf16.mxu1 %vm725_vm0, %v4108_v62  ;;  %v825_v8 = vadd.f32 %v4091_v43, %v824_v1 }
  0xf4   : > { %3431 = vmatprep.mubr.msk.bf16.mxu0 %vm725_vm0, %v4110_v0  ;;  %v3366_v7 = vpop.f32.mrf.mxu0  ;;  %3468 = vmatmul.mubr.msk.bf16.vlgmr.msra.gmra.mxu1 %vm725_vm0, %v4104_v58  ;;  %v1169_v16 = vadd.f32 %v4099_v52, %v1168_v4 }
  0xf5   : > { %v836_v9 = vadd.f32 %v3366_v7, %v4091_v43  ;;  %v3402_v10 = vpop.f32.mrf.mxu1  ;;  %3432 = vmatmul.mubr.msk.bf16.vlgmr.msra.gmra.mxu0 %vm725_vm0, %v4115_v3  ;;  %3540 = vmatpush3.bf16.msra.mxu1 %v3744_v41 }
  0xf6   : > { %3500 = vmatpush3.bf16.msra.mxu0 %v3740_v40  ;;  %v827_v11 = vpop.f32.mrf.mxu0  ;;  %3541 = vmatprep.subr.bf16.mxu1 %v3745_v2  ;;  %v1180_v12 = vadd.f32 %v3402_v10, %v4099_v52 }
  0xf7   : > { %v828_v13 = vadd.f32 %v4091_v43, %v827_v11  ;;  %v1171_v14 = vpop.f32.mrf.mxu1  ;;  %3501 = vmatprep.subr.bf16.mxu0 %v3741_v5  ;;  %v4137_v17 = vpack.c.bf16 %v836_v9, %v833_v6 }
  0xf8   : > { %v1172_v18 = vadd.f32 %v4099_v52, %v1171_v14  ;;  %v3369_v19 = vpop.f32.mrf.mxu0  ;;  %v4145_v25 = vpack.c.bf16 %v1180_v12, %v1177_v20 }
  0xf9   : > { %v4141_v21 = vpack.c.bf16 %v828_v13, %v825_v8  ;;  %v3405_v22 = vpop.f32.mrf.mxu1  ;;  %3542 = vmatpush3.bf16.msra.mxu1 %v3745_v2  ;;  %v849_v28 = vadd.f32 %v3369_v19, %v4091_v43 }
  0xfa   : > { %v4143_v23 = vpack.c.bf16 %v1172_v18, %v1169_v16  ;;  %v840_v24 = vpop.f32.mrf.mxu0  ;;  %3502 = vmatpush3.bf16.msra.mxu0 %v3741_v5  ;;  %v1193_v42 = vadd.f32 %v3405_v22, %v4099_v52 }
  0xfb   : > { %v1184_v26 = vpop.f32.mrf.mxu1  ;;  %3471 = vmatprep.mubr.msk.bf16.mxu1 %vm725_vm0, %v4141_v21  ;;  %3503 = vmatprep.subr.bf16.mxu0 %v3742_v15  ;;  %v841_v30 = vadd.f32 %v4091_v43, %v840_v24 }
  0xfc   : > { %3435 = vmatprep.mubr.msk.bf16.mxu0 %vm725_vm0, %v4143_v23  ;;  %v3370_v29 = vpop.f32.mrf.mxu0  ;;  %3472 = vmatmul.mubr.msk.bf16.gmra.mxu1 %vm725_vm0, %v4137_v17  ;;  %v1185_v38 = vadd.f32 %v4099_v52, %v1184_v26 }
  0xfd   : > { %v852_v31 = vadd.f32 %v3370_v29, %v4091_v43  ;;  %v3406_v32 = vpop.f32.mrf.mxu1  ;;  %3436 = vmatmul.mubr.msk.bf16.gmra.mxu0 %vm725_vm0, %v4145_v25 }
  0xfe   : > { %v843_v33 = vpop.f32.mrf.mxu0  ;;  %3504 = vmatpush3.bf16.msra.mxu0 %v3742_v15  ;;  %v1196_v34 = vadd.f32 %v3406_v32, %v4099_v52 }
  0xff   : > { %v844_v35 = vadd.f32 %v4091_v43, %v843_v33  ;;  %v1187_v36 = vpop.f32.mrf.mxu1  ;;  %3505 = vmatprep.subr.bf16.mxu0 %v3743_v27  ;;  %v4169_v39 = vpack.c.bf16 %v852_v31, %v849_v28 }
 0x100   : > { %v1188_v40 = vadd.f32 %v4099_v52, %v1187_v36  ;;  %v3373_v41 = vpop.f32.mrf.mxu0  ;;  %v4177_v48 = vpack.c.bf16 %v1196_v34, %v1193_v42 }
 0x101   : > { %v4173_v44 = vpack.c.bf16 %v844_v35, %v841_v30  ;;  %v3409_v45 = vpop.f32.mrf.mxu1  ;;  %v865_v50 = vadd.f32 %v3373_v41, %v4091_v43 }
 0x102   : > { %v4175_v46 = vpack.c.bf16 %v1188_v40, %v1185_v38  ;;  %v856_v47 = vpop.f32.mrf.mxu0  ;;  %3506 = vmatpush3.bf16.msra.mxu0 %v3743_v27  ;;  %v1209_v4 = vadd.f32 %v3409_v45, %v4099_v52 }
 0x103   : > { %v1200_v49 = vpop.f32.mrf.mxu1  ;;  %3475 = vmatprep.mubr.msk.bf16.mxu1 %vm725_vm0, %v4173_v44  ;;  %3575 = vmatprep.subr.bf16.mxu0 %v4166_v37  ;;  %v857_v53 = vadd.f32 %v4091_v43, %v856_v47 }
 0x104   : > { %3439 = vmatprep.mubr.msk.bf16.mxu0 %vm725_vm0, %v4175_v46  ;;  %v3374_v51 = vpop.f32.mrf.mxu0  ;;  %3476 = vmatmul.mubr.msk.bf16.gmra.mxu1 %vm725_vm0, %v4169_v39  ;;  %v1201_v61 = vadd.f32 %v4099_v52, %v1200_v49 }
 0x105   : > { %v868_v54 = vadd.f32 %v3374_v51, %v4091_v43  ;;  %v3410_v55 = vpop.f32.mrf.mxu1  ;;  %3440 = vmatmul.mubr.msk.bf16.gmra.mxu0 %vm725_vm0, %v4177_v48 }
 0x106   : > { %v859_v56 = vpop.f32.mrf.mxu0  ;;  %v1212_v57 = vadd.f32 %v3410_v55, %v4099_v52 }
 0x107   : > { %v860_v59 = vadd.f32 %v4091_v43, %v859_v56  ;;  %v1203_v60 = vpop.f32.mrf.mxu1  ;;  %v4194_v63 = vpack.c.bf16 %v868_v54, %v865_v50 }
 0x108   : > { %v1204_v1 = vadd.f32 %v4099_v52, %v1203_v60  ;;  %v3377_v2 = vpop.f32.mrf.mxu0  ;;  %v4202_v9 = vpack.c.bf16 %v1212_v57, %v1209_v4 }
 0x109   : > { %v4198_v5 = vpack.c.bf16 %v860_v59, %v857_v53  ;;  %v3413_v6 = vpop.f32.mrf.mxu1  ;;  %v881_v11 = vadd.f32 %v3377_v2, %v4091_v43 }
 0x10a   : > { %v4200_v7 = vpack.c.bf16 %v1204_v1, %v1201_v61  ;;  %v872_v8 = vpop.f32.mrf.mxu0  ;;  %v1225_v28 = vadd.f32 %v3413_v6, %v4099_v52 }
 0x10b   : > { %v1216_v10 = vpop.f32.mrf.mxu1  ;;  %3479 = vmatprep.mubr.msk.bf16.mxu1 %vm725_vm0, %v4198_v5  ;;  %v873_v13 = vadd.f32 %v4091_v43, %v872_v8 }
 0x10c   : > { %3443 = vmatprep.mubr.msk.bf16.mxu0 %vm725_vm0, %v4200_v7  ;;  %v3378_v12 = vpop.f32.mrf.mxu0  ;;  %3480 = vmatmul.mubr.msk.bf16.gmra.mxu1 %vm725_vm0, %v4194_v63  ;;  %v1217_v22 = vadd.f32 %v4099_v52, %v1216_v10 }
 0x10d   : > { %v884_v14 = vadd.f32 %v3378_v12, %v4091_v43  ;;  %v3414_v15 = vpop.f32.mrf.mxu1  ;;  %3444 = vmatmul.mubr.msk.bf16.gmra.mxu0 %vm725_vm0, %v4202_v9 }
 0x10e   : > { %v875_v16 = vpop.f32.mrf.mxu0  ;;  %v1228_v18 = vadd.f32 %v3414_v15, %v4099_v52 }
 0x10f   : > { %v876_v19 = vadd.f32 %v4091_v43, %v875_v16  ;;  %v1219_v20 = vpop.f32.mrf.mxu1  ;;  %v4218_v24 = vpack.c.bf16 %v884_v14, %v881_v11 }
 0x110   : > { %v1220_v26 = vadd.f32 %v4099_v52, %v1219_v20  ;;  %v3381_v27 = vpop.f32.mrf.mxu0  ;;  %v4226_v33 = vpack.c.bf16 %v1228_v18, %v1225_v28 }
 0x111   : > { %v4222_v29 = vpack.c.bf16 %v876_v19, %v873_v13  ;;  %v3417_v30 = vpop.f32.mrf.mxu1  ;;  %v897_v35 = vadd.f32 %v3381_v27, %v4091_v43 }
 0x112   : > { %v4224_v31 = vpack.c.bf16 %v1220_v26, %v1217_v22  ;;  %v888_v32 = vpop.f32.mrf.mxu0  ;;  %v1241_v55 = vadd.f32 %v3417_v30, %v4099_v52 }
 0x113   : > { %v1232_v34 = vpop.f32.mrf.mxu1  ;;  %3483 = vmatprep.mubr.msk.bf16.mxu1 %vm725_vm0, %v4222_v29  ;;  %v889_v38 = vadd.f32 %v4091_v43, %v888_v32 }
 0x114   : > { %3447 = vmatprep.mubr.msk.bf16.mxu0 %vm725_vm0, %v4224_v31  ;;  %v3382_v36 = vpop.f32.mrf.mxu0  ;;  %3484 = vmatmul.mubr.msk.bf16.gmra.mxu1 %vm725_vm0, %v4218_v24  ;;  %v1233_v50 = vadd.f32 %v4099_v52, %v1232_v34 }
 0x115   : > { %v900_v40 = vadd.f32 %v3382_v36, %v4091_v43  ;;  %v3418_v41 = vpop.f32.mrf.mxu1  ;;  %3448 = vmatmul.mubr.msk.bf16.gmra.mxu0 %vm725_vm0, %v4226_v33 }
 0x116   : > { %v891_v42 = vpop.f32.mrf.mxu0  ;;  %v1244_v45 = vadd.f32 %v3418_v41, %v4099_v52 }
 0x117   : > { %v892_v47 = vadd.f32 %v4091_v43, %v891_v42  ;;  %v1235_v49 = vpop.f32.mrf.mxu1  ;;  %v4242_v51 = vpack.c.bf16 %v900_v40, %v897_v35 }
 0x118   : > { %v1236_v53 = vadd.f32 %v4099_v52, %v1235_v49  ;;  %v3385_v54 = vpop.f32.mrf.mxu0  ;;  %v4250_v61 = vpack.c.bf16 %v1244_v45, %v1241_v55 }
 0x119   : > { %v4246_v56 = vpack.c.bf16 %v892_v47, %v889_v38  ;;  %v3421_v57 = vpop.f32.mrf.mxu1  ;;  %v913_v2 = vadd.f32 %v3385_v54, %v4091_v43 }
 0x11a   : > { %v4248_v59 = vpack.c.bf16 %v1236_v53, %v1233_v50  ;;  %v904_v60 = vpop.f32.mrf.mxu0  ;;  %v1257_v20 = vadd.f32 %v3421_v57, %v4099_v52 }
 0x11b   : > { %v1248_v1 = vpop.f32.mrf.mxu1  ;;  %3487 = vmatprep.mubr.msk.bf16.mxu1 %vm725_vm0, %v4246_v56  ;;  %v905_v6 = vadd.f32 %v4091_v43, %v904_v60  ;;  %v3746_v60 = vld [vmem:[%s4050_s28] sm:$0xff]  }
 0x11c   : > { %3451 = vmatprep.mubr.msk.bf16.mxu0 %vm725_vm0, %v4248_v59  ;;  %v3386_v4 = vpop.f32.mrf.mxu0  ;;  %3488 = vmatmul.mubr.msk.bf16.gmra.mxu1 %vm725_vm0, %v4242_v51  ;;  %v1249_v15 = vadd.f32 %v4099_v52, %v1248_v1 }
 0x11d   : > { %v916_v8 = vadd.f32 %v3386_v4, %v4091_v43  ;;  %v3422_v10 = vpop.f32.mrf.mxu1  ;;  %3452 = vmatmul.mubr.msk.bf16.gmra.mxu0 %vm725_vm0, %v4250_v61  ;;  %v3750_v4 = vld [vmem:[%s4050_s28 + $0x20] sm:$0xff]  }
 0x11e   : > { %v907_v11 = vpop.f32.mrf.mxu0  ;;  %v1260_v12 = vadd.f32 %v3422_v10, %v4099_v52  ;;  %v3760_v10 = vld [vmem:[%s4050_s28 + $0x70] sm:$0xff]  }
 0x11f   : > { %v908_v13 = vadd.f32 %v4091_v43, %v907_v11  ;;  %v1251_v14 = vpop.f32.mrf.mxu1  ;;  %v4266_v16 = vpack.c.bf16 %v916_v8, %v913_v2  ;;  %v3763_v2 = vld [vmem:[%s4916_s14] sm:$0xff]   ;;  %v3761_v11 = vld [vmem:[%s4050_s28 + $0x78] sm:$0xff]  }
 0x120   : > { %v1252_v18 = vadd.f32 %v4099_v52, %v1251_v14  ;;  %v3389_v19 = vpop.f32.mrf.mxu0  ;;  %v4274_v30 = vpack.c.bf16 %v1260_v12, %v1257_v20  ;;  %v3758_v8 = vld [vmem:[%s4050_s28 + $0x60] sm:$0xff]   ;;  %v3769_v12 = vld [vmem:[%s4915_s13 + $0x10] sm:$0xff]  }
 0x121   : > { %v4270_v22 = vpack.c.bf16 %v908_v13, %v905_v6  ;;  %v3425_v26 = vpop.f32.mrf.mxu1  ;;  %v929_v34 = vadd.f32 %v3389_v19, %v4091_v43  ;;  %v3756_v6 = vld [vmem:[%s4050_s28 + $0x50] sm:$0xff]   ;;  %v3770_v13 = vld [vmem:[%s4915_s13 + $0x8] sm:$0xff]  }
 0x122   : > { %v4272_v27 = vpack.c.bf16 %v1252_v18, %v1249_v15  ;;  %v920_v28 = vpop.f32.mrf.mxu0  ;;  %v1273_v54 = vadd.f32 %v3425_v26, %v4099_v52 }
 0x123   : > { %v1264_v32 = vpop.f32.mrf.mxu1  ;;  %3491 = vmatprep.mubr.msk.bf16.mxu1 %vm725_vm0, %v4270_v22  ;;  %v921_v36 = vadd.f32 %v4091_v43, %v920_v28 }
 0x124   : > { %3455 = vmatprep.mubr.msk.bf16.mxu0 %vm725_vm0, %v4272_v27  ;;  %v3390_v35 = vpop.f32.mrf.mxu0  ;;  %3492 = vmatmul.mubr.msk.bf16.gmra.mxu1 %vm725_vm0, %v4266_v16  ;;  %v1265_v49 = vadd.f32 %v4099_v52, %v1264_v32 }
 0x125   : > { %v932_v38 = vadd.f32 %v3390_v35, %v4091_v43  ;;  %v3426_v40 = vpop.f32.mrf.mxu1  ;;  %3456 = vmatmul.mubr.msk.bf16.gmra.mxu0 %vm725_vm0, %v4274_v30 }
 0x126   : > { %v923_v41 = vpop.f32.mrf.mxu0  ;;  %v1276_v42 = vadd.f32 %v3426_v40, %v4099_v52 }
 0x127   : > { %v924_v45 = vadd.f32 %v4091_v43, %v923_v41  ;;  %v1267_v47 = vpop.f32.mrf.mxu1  ;;  %v4290_v50 = vpack.c.bf16 %v932_v38, %v929_v34  ;;  %v3747_v43 = vld [vmem:[%s4050_s28 + $0x8] sm:$0xff]  }
 0x128   : > { %v1268_v53 = vadd.f32 %v4099_v52, %v1267_v47  ;;  %v4299_v1 = vpack.c.bf16 %v1276_v42, %v1273_v54  ;;  %v3748_v52 = vld [vmem:[%s4050_s28 + $0x10] sm:$0xff]  }
 0x129   : > { %v4294_v55 = vpack.c.bf16 %v924_v45, %v921_v36 }
 0x12a   : > { %v4296_v57 = vpack.c.bf16 %v1268_v53, %v1265_v49 }
 0x12b   : > { %3495 = vmatprep.mubr.msk.bf16.mxu1 %vm725_vm0, %v4294_v55 }
 0x12c   : > { %3459 = vmatprep.mubr.msk.bf16.mxu0 %vm725_vm0, %v4296_v57  ;;  %3496 = vmatmul.mubr.msk.bf16.gmra.mxu1 %vm725_vm0, %v4290_v50 }
 0x12d   : > { %3460 = vmatmul.mubr.msk.bf16.gmra.mxu0 %vm725_vm0, %v4299_v1  ;;  %3543 = vmatprep.mubr.msk.bf16.mxu1 %vm725_vm0, %v4110_v0  ;;  %v3749_v0 = vld [vmem:[%s4050_s28 + $0x18] sm:$0xff]  }
 0x12e   : > { %3507 = vmatprep.mubr.msk.bf16.mxu0 %vm1951_vm1, %v3746_v60 }
 0x134   : > { %3544 = vmatmul.mubr.msk.bf16.vlgmr.msra.gmra.mxu1 %vm725_vm0, %v4115_v3  ;;  %v3751_v3 = vld [vmem:[%s4050_s28 + $0x28] sm:$0xff]  }
 0x135   : > { %3508 = vmatmul.mubr.msk.bf16.vlgmr.msra.gmra.mxu0 %vm1951_vm1, %v3747_v43  ;;  %3547 = vmatprep.mubr.msk.bf16.mxu1 %vm725_vm0, %v4143_v23  ;;  %v3752_v23 = vld [vmem:[%s4050_s28 + $0x30] sm:$0xff]  }
 0x136   : > { %3511 = vmatprep.mubr.msk.bf16.mxu0 %vm1951_vm1, %v3748_v52  ;;  %3576 = vmatpush3.bf16.msra.mxu0 %v4166_v37  ;;  %v3764_v37 = vld [vmem:[%s4915_s13 + $0x38] sm:$0xff]  }
 0x137   : > { %3577 = vmatprep.subr.bf16.mxu0 %v3763_v2  ;;  %3611 = vmatprep.subr.bf16.mxu1 %v3764_v37 }
 0x138   : > { %3612 = vmatpush3.bf16.msra.mxu1 %v3764_v37 }
 0x13a   : > { %3578 = vmatpush3.bf16.msra.mxu0 %v3763_v2 }
 0x13c   : > { %3548 = vmatmul.mubr.msk.bf16.gmra.mxu1 %vm725_vm0, %v4145_v25  ;;  %v3753_v25 = vld [vmem:[%s4050_s28 + $0x38] sm:$0xff]  }
 0x13d   : > { %3512 = vmatmul.mubr.msk.bf16.gmra.mxu0 %vm1951_vm1, %v3749_v0  ;;  %3551 = vmatprep.mubr.msk.bf16.mxu1 %vm725_vm0, %v4175_v46  ;;  %v3754_v46 = vld [vmem:[%s4050_s28 + $0x40] sm:$0xff]  }
 0x13e   : > { %3515 = vmatprep.mubr.msk.bf16.mxu0 %vm1951_vm1, %v3750_v4 }
 0x144   : > { %3552 = vmatmul.mubr.msk.bf16.gmra.mxu1 %vm725_vm0, %v4177_v48  ;;  %v3765_v48 = vld [vmem:[%s4915_s13 + $0x30] sm:$0xff]  }
 0x145   : > { %3516 = vmatmul.mubr.msk.bf16.gmra.mxu0 %vm1951_vm1, %v3751_v3  ;;  %3555 = vmatprep.mubr.msk.bf16.mxu1 %vm725_vm0, %v4200_v7  ;;  %v3755_v7 = vld [vmem:[%s4050_s28 + $0x48] sm:$0xff]  }
 0x146   : > { %3519 = vmatprep.mubr.msk.bf16.mxu0 %vm1951_vm1, %v3752_v23  ;;  %3613 = vmatprep.subr.bf16.mxu1 %v3765_v48 }
 0x147   : > { %3614 = vmatpush3.bf16.msra.mxu1 %v3765_v48 }
 0x14c   : > { %3556 = vmatmul.mubr.msk.bf16.gmra.mxu1 %vm725_vm0, %v4202_v9  ;;  %v3766_v9 = vld [vmem:[%s4915_s13 + $0x28] sm:$0xff]  }
 0x14d   : > { %3520 = vmatmul.mubr.msk.bf16.gmra.mxu0 %vm1951_vm1, %v3753_v25  ;;  %3559 = vmatprep.mubr.msk.bf16.mxu1 %vm725_vm0, %v4224_v31  ;;  %v3757_v31 = vld [vmem:[%s4050_s28 + $0x58] sm:$0xff]  }
 0x14e   : > { %3523 = vmatprep.mubr.msk.bf16.mxu0 %vm1951_vm1, %v3754_v46  ;;  %3615 = vmatprep.subr.bf16.mxu1 %v3766_v9 }
 0x14f   : > { %3616 = vmatpush3.bf16.msra.mxu1 %v3766_v9 }
 0x154   : > { %3560 = vmatmul.mubr.msk.bf16.gmra.mxu1 %vm725_vm0, %v4226_v33  ;;  %v3767_v33 = vld [vmem:[%s4915_s13 + $0x20] sm:$0xff]  }
 0x155   : > { %3524 = vmatmul.mubr.msk.bf16.gmra.mxu0 %vm1951_vm1, %v3755_v7  ;;  %3563 = vmatprep.mubr.msk.bf16.mxu1 %vm725_vm0, %v4248_v59  ;;  %v3759_v59 = vld [vmem:[%s4050_s28 + $0x68] sm:$0xff]   ;;  %v4513_v7 = vld [vmem:[%s4914_s12] ss:$0 sm:$0xff]  ;;  %s4720_s28 = scalar_lea.vmem %s4905_s3, %s3008_s18  ;;  %s4854_s18 = scalar_lea.hbm %s4918_s16, %s3202_s27 }
 0x156   : > { %3527 = vmatprep.mubr.msk.bf16.mxu0 %vm1951_vm1, %v3756_v6  ;;  %3617 = vmatprep.subr.bf16.mxu1 %v3767_v33 }
 0x157   : > { %3618 = vmatpush3.bf16.msra.mxu1 %v3767_v33 }
 0x15c   : > { %3564 = vmatmul.mubr.msk.bf16.gmra.mxu1 %vm725_vm0, %v4250_v61  ;;  %v3768_v61 = vld [vmem:[%s4915_s13 + $0x18] sm:$0xff]  }
 0x15d   : > { %3528 = vmatmul.mubr.msk.bf16.gmra.mxu0 %vm1951_vm1, %v3757_v31  ;;  %3567 = vmatprep.mubr.msk.bf16.mxu1 %vm725_vm0, %v4272_v27  ;;  %v4518_v31 = vld [vmem:[%s4912_s10] ss:$0 sm:$0xff] }
 0x15e   : > { %3531 = vmatprep.mubr.msk.bf16.mxu0 %vm1951_vm1, %v3758_v8  ;;  %3619 = vmatprep.subr.bf16.mxu1 %v3768_v61 }
 0x15f   : > { %3620 = vmatpush3.bf16.msra.mxu1 %v3768_v61 }
 0x160   : > { %3621 = vmatprep.subr.bf16.mxu1 %v3769_v12 }
 0x163   : > { %3622 = vmatpush3.bf16.msra.mxu1 %v3769_v12 }
 0x164   : > { %3568 = vmatmul.mubr.msk.bf16.gmra.mxu1 %vm725_vm0, %v4274_v30  ;;  %3623 = vmatprep.subr.bf16.mxu1 %v3770_v13 }
 0x165   : > { %3532 = vmatmul.mubr.msk.bf16.gmra.mxu0 %vm1951_vm1, %v3759_v59  ;;  %3571 = vmatprep.mubr.msk.bf16.mxu1 %vm725_vm0, %v4296_v57 }
 0x166   : > { %3535 = vmatprep.mubr.msk.bf16.mxu0 %vm1951_vm1, %v3760_v10 }
 0x167   : > { %3624 = vmatpush3.bf16.msra.mxu1 %v3770_v13 }
 0x16c   : > { %3572 = vmatmul.mubr.msk.bf16.gmra.mxu1 %vm725_vm0, %v4299_v1 }
 0x16d   : > { %3536 = vmatmul.mubr.msk.bf16.gmra.mxu0 %vm1951_vm1, %v3761_v11 }
 0x16e   : > { %3579 = vmatprep.mubr.msk.bf16.mxu0 %vm725_vm0, %v4108_v62  ;;  %v3771_v62 = vld [vmem:[%s4915_s13] sm:$0xff]  }
 0x16f   : > { %3625 = vmatprep.subr.bf16.mxu1 %v3771_v62 }
 0x170   : > { %3626 = vmatpush3.bf16.msra.mxu1 %v3771_v62 }
 0x175   : > { %3580 = vmatmul.mubr.msk.bf16.vlgmr.msra.gmra.mxu0 %vm725_vm0, %v4104_v58 }
 0x176   : > { %3583 = vmatprep.mubr.msk.bf16.mxu0 %vm725_vm0, %v4141_v21 }
 0x17d   : > { %3584 = vmatmul.mubr.msk.bf16.gmra.mxu0 %vm725_vm0, %v4137_v17 }
 0x17e   : > { %3587 = vmatprep.mubr.msk.bf16.mxu0 %vm725_vm0, %v4173_v44 }
 0x185   : > { %3588 = vmatmul.mubr.msk.bf16.gmra.mxu0 %vm725_vm0, %v4169_v39 }
 0x186   : > { %3591 = vmatprep.mubr.msk.bf16.mxu0 %vm725_vm0, %v4198_v5 }
 0x18d   : > { %3592 = vmatmul.mubr.msk.bf16.gmra.mxu0 %vm725_vm0, %v4194_v63 }
 0x18e   : > { %3595 = vmatprep.mubr.msk.bf16.mxu0 %vm725_vm0, %v4222_v29 }
 0x195   : > { %3596 = vmatmul.mubr.msk.bf16.gmra.mxu0 %vm725_vm0, %v4218_v24 }
 0x196   : > { %3599 = vmatprep.mubr.msk.bf16.mxu0 %vm725_vm0, %v4246_v56 }
 0x19d   : > { %3600 = vmatmul.mubr.msk.bf16.gmra.mxu0 %vm725_vm0, %v4242_v51 }
 0x19e   : > { %3603 = vmatprep.mubr.msk.bf16.mxu0 %vm725_vm0, %v4270_v22 }
 0x1a5   : > { %3604 = vmatmul.mubr.msk.bf16.gmra.mxu0 %vm725_vm0, %v4266_v16 }
 0x1a6   : > { %3607 = vmatprep.mubr.msk.bf16.mxu0 %vm725_vm0, %v4294_v55 }
 0x1ad   : > { %3608 = vmatmul.mubr.msk.bf16.gmra.mxu0 %vm725_vm0, %v4290_v50 }
 0x1b4   : > { %v3469_v58 = vpop.f32.mrf.mxu1 }
 0x1b5   : > { %v3433_v17 = vpop.f32.mrf.mxu0 }
 0x1b6   : > { %v1634_v21 = vpop.f32.mrf.mxu1  ;;  %v1643_v6 = vadd.f32 %v3469_v58, %v3433_v17 }
 0x1b7   : > { %v1413_v39 = vpop.f32.mrf.mxu0 }
 0x1b8   : > { %v3470_v63 = vpop.f32.mrf.mxu1  ;;  %v1635_v8 = vadd.f32 %v1634_v21, %v1413_v39  ;;  %v1770_v12 = vadd.f32 %v4518_v31, %v1643_v6 }
 0x1b9   : > { %v3434_v44 = vpop.f32.mrf.mxu0 }
 0x1ba   : > { %v1637_v24 = vpop.f32.mrf.mxu1  ;;  %v1646_v9 = vadd.f32 %v3470_v63, %v3434_v44  ;;  %v1768_v17 = vadd.f32 %v4518_v31, %v1635_v8 }
 0x1bb   : > { %v1416_v5 = vpop.f32.mrf.mxu0 }
 0x1bc   : > { %v3473_v56 = vpop.f32.mrf.mxu1  ;;  %v1638_v59 = vadd.f32 %v1637_v24, %v1416_v5  ;;  %v1771_v13 = vadd.f32 %v4518_v31, %v1646_v9 }
 0x1bd   : > { %v4432_v29 = vpop.f32.mrf.mxu0 }
 0x1be   : > { %v4440_v16 = vpop.f32.mrf.mxu1  ;;  %v1769_v21 = vadd.f32 %v4518_v31, %v1638_v59  ;;  %v1659_v24 = vadd.f32 %v3473_v56, %v4432_v29 }
 0x1bf   : > { %v4434_v51 = vpop.f32.mrf.mxu0 }
 0x1c0   : > { %v3474_v20 = vpop.f32.mrf.mxu1  ;;  %v1651_v8 = vadd.f32 %v4440_v16, %v4434_v51  ;;  %v1774_v56 = vadd.f32 %v4518_v31, %v1659_v24 }
 0x1c1   : > { %v4436_v14 = vpop.f32.mrf.mxu0 }
 0x1c2   : > { %v1653_v27 = vpop.f32.mrf.mxu1  ;;  %v1662_v9 = vadd.f32 %v3474_v20, %v4436_v14  ;;  %v1772_v51 = vadd.f32 %v4518_v31, %v1651_v8 }
 0x1c3   : > { %v4438_v15 = vpop.f32.mrf.mxu0 }
 0x1c4   : > { %v4454_v32 = vpop.f32.mrf.mxu1  ;;  %v1654_v59 = vadd.f32 %v1653_v27, %v4438_v15 }
 0x1c5   : > { %v4442_v18 = vpop.f32.mrf.mxu0 }
 0x1c6   : > { %v4460_v36 = vpop.f32.mrf.mxu1  ;;  %v1773_v15 = vadd.f32 %v4518_v31, %v1654_v59 }
 0x1c7   : > { %v4444_v19 = vpop.f32.mrf.mxu0 }
 0x1c8   : > { %v4466_v41 = vpop.f32.mrf.mxu1  ;;  %v1667_v24 = vadd.f32 %v4460_v36, %v4444_v19 }
 0x1c9   : > { %v4446_v22 = vpop.f32.mrf.mxu0 }
 0x1ca   : > { %v4472_v47 = vpop.f32.mrf.mxu1  ;;  %v1776_v19 = vadd.f32 %v4518_v31, %v1667_v24 }
 0x1cb   : > { %v4448_v26 = vpop.f32.mrf.mxu0 }
 0x1cc   : > { %v4478_v53 = vpop.f32.mrf.mxu1 }
 0x1cd   : > { %v4450_v28 = vpop.f32.mrf.mxu0 }
 0x1ce   : > { %v4484_v57 = vpop.f32.mrf.mxu1 }
 0x1cf   : > { %v4452_v30 = vpop.f32.mrf.mxu0 }
 0x1d0   : > { %v4490_v43 = vpop.f32.mrf.mxu1 }
 0x1d1   : > { %v4456_v34 = vpop.f32.mrf.mxu0 }
 0x1d2   : > { %v4496_v0 = vpop.f32.mrf.mxu1 }
 0x1d3   : > { %v4458_v35 = vpop.f32.mrf.mxu0 }
 0x1d4   : > { %v4502_v23 = vpop.f32.mrf.mxu1 }
 0x1d5   : > { %v4462_v38 = vpop.f32.mrf.mxu0 }
 0x1d6   : > { %v4508_v46 = vpop.f32.mrf.mxu1 }
 0x1d7   : > { %v4464_v40 = vpop.f32.mrf.mxu0 }
 0x1d8   : > { %v4521_v61 = vpop.f32.mrf.mxu1 }
 0x1d9   : > { %v4468_v42 = vpop.f32.mrf.mxu0 }
 0x1db   : > { %v4470_v45 = vpop.f32.mrf.mxu0 }
 0x1dd   : > { %v4474_v49 = vpop.f32.mrf.mxu0 }
 0x1df   : > { %v4476_v50 = vpop.f32.mrf.mxu0 }
 0x1e1   : > { %v4480_v54 = vpop.f32.mrf.mxu0 }
 0x1e3   : > { %v4482_v55 = vpop.f32.mrf.mxu0 }
 0x1e5   : > { %v4486_v60 = vpop.f32.mrf.mxu0 }
 0x1e7   : > { %v4488_v1 = vpop.f32.mrf.mxu0 }
 0x1e9   : > { %v4492_v52 = vpop.f32.mrf.mxu0 }
 0x1eb   : > { %v4494_v2 = vpop.f32.mrf.mxu0 }
 0x1ed   : > { %v4498_v4 = vpop.f32.mrf.mxu0 }
 0x1ef   : > { %v4500_v3 = vpop.f32.mrf.mxu0 }
 0x1f0   : > { %4933 = vst [vmem:[#allocation8_spill] sm:$0xff] %v4500_v3 }
 0x1f1   : > { %v4504_v37 = vpop.f32.mrf.mxu0 }
 0x1f3   : > { %v4506_v25 = vpop.f32.mrf.mxu0 }
 0x1f4   : > { %4934 = vst [vmem:[#allocation9_spill] sm:$0xff] %v4506_v25 }
 0x1f5   : > { %v3509_v48 = vpop.f32.mrf.mxu0 }
 0x1f6   : > { %v2043_v10 = vadd.f32 %v3509_v48, %v4513_v7  ;;  %v4531_v48 = vpop.f32.mrf.mxu1 }
 0x1f7   : > { %v2034_v33 = vpop.f32.mrf.mxu0 }
 0x1f8   : > { %v2035_v62 = vadd.f32 %v4513_v7, %v2034_v33  ;;  %v2163_v39 = vmul.f32 %v2043_v10, %v1770_v12 }
 0x1f9   : > { %v3510_v11 = vpop.f32.mrf.mxu0 }
 0x1fa   : > { %v2046_v58 = vadd.f32 %v3510_v11, %v4513_v7  ;;  %v2161_v25 = vmul.f32 %v2035_v62, %v1768_v17  ;;  %v1675_v62 = vadd.f32 %v4454_v32, %v4442_v18 }
 0x1fb   : > { %v2037_v44 = vpop.f32.mrf.mxu0 }
 0x1fc   : > { %v2164_v63 = vmul.f32 %v2046_v58, %v1771_v13  ;;  %v2038_v5 = vadd.f32 %v4513_v7, %v2037_v44  ;;  %v4538_v13 = vpop.f32.mrf.mxu1  ;;  %v1775_v58 = vadd.f32 %v4518_v31, %v1662_v9  ;;  %v1670_v9 = vadd.f32 %v4472_v47, %v4448_v26 }
 0x1fd   : > { %v3513_v6 = vpop.f32.mrf.mxu0 }
 0x1fe   : > { %v2194_v33 = vpack.c.bf16 %v2164_v63, %v2163_v39  ;;  %v2162_v3 = vmul.f32 %v2038_v5, %v1769_v21  ;;  %v2059_v10 = vadd.f32 %v3513_v6, %v4513_v7  ;;  %v4549_v17 = vpop.f32.mrf.mxu1  ;;  %v1678_v21 = vadd.f32 %v4466_v41, %v4446_v22 }
 0x1ff   : > { %v2050_v11 = vpop.f32.mrf.mxu0  ;;  %v1777_v26 = vadd.f32 %v4518_v31, %v1670_v9  ;;  %v1710_v9 = vadd.f32 %v4521_v61, %v4468_v42 }
 0x200   : > { %v2193_v12 = vpack.c.bf16 %v2162_v3, %v2161_v25  ;;  %v2051_v14 = vadd.f32 %v4513_v7, %v2050_v11  ;;  %v2167_v27 = vmul.f32 %v2059_v10, %v1774_v56  ;;  %v4558_v18 = vpop.f32.mrf.mxu1  ;;  %v1778_v11 = vadd.f32 %v4518_v31, %v1675_v62 }
 0x201   : > { %v3514_v29 = vpop.f32.mrf.mxu0  ;;  %v1779_v22 = vadd.f32 %v4518_v31, %v1678_v21 }
 0x202   : > { %v2062_v20 = vadd.f32 %v3514_v29, %v4513_v7  ;;  %3627 = vmatprep.mubr.bf16.mxu1 %v2193_v12  ;;  %v2165_v39 = vmul.f32 %v2051_v14, %v1772_v51  ;;  %v1691_v29 = vadd.f32 %v4478_v53, %v4450_v28  ;;  %v1717_v56 = vpop.f32.mrf.mxu1  ;;  %v1694_v14 = vadd.f32 %v4490_v43, %v4456_v34 }
 0x203   : > { %v2053_v16 = vpop.f32.mrf.mxu0  ;;  %3628 = vmatmul.mubr.bf16.vlgmr.msra.gmra.mxu1 %v2194_v33 }
 0x204   : > { %v2168_v3 = vmul.f32 %v2062_v20, %v1775_v58  ;;  %v2054_v25 = vadd.f32 %v4513_v7, %v2053_v16  ;;  %v1782_v53 = vadd.f32 %v4518_v31, %v1691_v29  ;;  %v1783_v34 = vadd.f32 %v4518_v31, %v1694_v14 }
 0x205   : > { %v3517_v44 = vpop.f32.mrf.mxu0  ;;  %v1726_v14 = vadd.f32 %v4558_v18, %v4480_v54 }
 0x206   : > { %v2166_v63 = vmul.f32 %v2054_v25, %v1773_v15  ;;  %v2196_v5 = vpack.c.bf16 %v2168_v3, %v2167_v27  ;;  %v2075_v33 = vadd.f32 %v3517_v44, %v4513_v7  ;;  %v1683_v15 = vadd.f32 %v4484_v57, %v4452_v30  ;;  %v4576_v44 = vpop.f32.mrf.mxu1 }
 0x207   : > { %v2066_v6 = vpop.f32.mrf.mxu0  ;;  %v1686_v3 = vadd.f32 %v4496_v0, %v4458_v35 }
 0x208   : > { %v2195_v8 = vpack.c.bf16 %v2166_v63, %v2165_v39  ;;  %v2067_v41 = vadd.f32 %v4513_v7, %v2066_v6  ;;  %v2171_v47 = vmul.f32 %v2075_v33, %v1778_v11  ;;  %v1780_v30 = vadd.f32 %v4518_v31, %v1683_v15  ;;  %v1730_v24 = vpop.f32.mrf.mxu1 }
 0x209   : > { %v3518_v32 = vpop.f32.mrf.mxu0  ;;  %v1781_v35 = vadd.f32 %v4518_v31, %v1686_v3  ;;  %v1699_v11 = vadd.f32 %v4508_v46, %v4464_v40  ;;  %v1715_v15 = vadd.f32 %v4549_v17, %v4476_v50  ;;  %v1718_v3 = vadd.f32 %v1717_v56, %v4482_v55 }
 0x20a   : > { %v2078_v59 = vadd.f32 %v3518_v32, %v4513_v7  ;;  %3631 = vmatprep.mubr.bf16.mxu1 %v2195_v8  ;;  %v2169_v20 = vmul.f32 %v2067_v41, %v1776_v19  ;;  %v1702_v41 = vadd.f32 %v4531_v48, %v4470_v45 }
 0x20b   : > { %v2069_v36 = vpop.f32.mrf.mxu0  ;;  %3632 = vmatmul.mubr.bf16.gmra.mxu1 %v2196_v5  ;;  %v1707_v5 = vadd.f32 %v4502_v23, %v4462_v38  ;;  %v1784_v40 = vadd.f32 %v4518_v31, %v1699_v11  ;;  %v1789_v55 = vadd.f32 %v4518_v31, %v1718_v3 }
 0x20c   : > { %v2172_v10 = vmul.f32 %v2078_v59, %v1779_v22  ;;  %v2070_v12 = vadd.f32 %v4513_v7, %v2069_v36  ;;  %v3494_v36 = vpop.f32.mrf.mxu1  ;;  %v1785_v45 = vadd.f32 %v4518_v31, %v1702_v41 }
 0x20d   : > { %v3521_v58 = vpop.f32.mrf.mxu0  ;;  %v1786_v23 = vadd.f32 %v4518_v31, %v1707_v5  ;;  %v1731_v5 = vadd.f32 %v1730_v24, %v4488_v1 }
 0x20e   : > { %v2170_v51 = vmul.f32 %v2070_v12, %v1777_v26  ;;  %v2198_v16 = vpack.c.bf16 %v2172_v10, %v2171_v47  ;;  %v2091_v25 = vadd.f32 %v3521_v58, %v4513_v7  ;;  %v1787_v26 = vadd.f32 %v4518_v31, %v1710_v9  ;;  %v1733_v29 = vpop.f32.mrf.mxu1 }
 0x20f   : > { %v2082_v27 = vpop.f32.mrf.mxu0  ;;  %v1723_v12 = vadd.f32 %v4538_v13, %v4474_v49  ;;  %v1791_v13 = vadd.f32 %v4518_v31, %v1726_v14  ;;  %v1734_v9 = vadd.f32 %v1733_v29, %v4494_v2  ;;  %v1792_v41 = vadd.f32 %v4518_v31, %v1731_v5 }
 0x210   : > { %v2197_v62 = vpack.c.bf16 %v2170_v51, %v2169_v20  ;;  %v2083_v43 = vadd.f32 %v4513_v7, %v2082_v27  ;;  %v2175_v0 = vmul.f32 %v2091_v25, %v1782_v53 }
 0x211   : > { %v3522_v28 = vpop.f32.mrf.mxu0  ;;  %v1790_v49 = vadd.f32 %v4518_v31, %v1723_v12  ;;  %v1793_v2 = vadd.f32 %v4518_v31, %v1734_v9 }
 0x212   : > { %v2094_v21 = vadd.f32 %v3522_v28, %v4513_v7  ;;  %3635 = vmatprep.mubr.bf16.mxu1 %v2197_v62  ;;  %v2173_v33 = vmul.f32 %v2083_v43, %v1780_v30  ;;  %v3497_v28 = vpop.f32.mrf.mxu1 }
 0x213   : > { %v2085_v57 = vpop.f32.mrf.mxu0  ;;  %3636 = vmatmul.mubr.bf16.gmra.mxu1 %v2198_v16 }
 0x214   : > { %v2176_v39 = vmul.f32 %v2094_v21, %v1783_v34  ;;  %v2086_v63 = vadd.f32 %v4513_v7, %v2085_v57  ;;  %v1788_v34 = vadd.f32 %v4518_v31, %v1715_v15  ;;  %v1739_v21 = vadd.f32 %v4576_v44, %v4486_v60  ;;  %v1746_v30 = vpop.f32.mrf.mxu1 }
 0x215   : > { %v3525_v6 = vpop.f32.mrf.mxu0 }
 0x216   : > { %v2174_v8 = vmul.f32 %v2086_v63, %v1781_v35  ;;  %v2200_v32 = vpack.c.bf16 %v2176_v39, %v2175_v0  ;;  %v2107_v59 = vadd.f32 %v3525_v6, %v4513_v7  ;;  %v1742_v35 = vadd.f32 %v3494_v36, %v4492_v52 }
 0x217   : > { %v2098_v22 = vpop.f32.mrf.mxu0  ;;  %v1755_v36 = vadd.f32 %v3497_v28, %v4498_v4 }
 0x218   : > { %v2199_v19 = vpack.c.bf16 %v2174_v8, %v2173_v33  ;;  %v2099_v42 = vadd.f32 %v4513_v7, %v2098_v22  ;;  %v2179_v48 = vmul.f32 %v2107_v59, %v1786_v23  ;;  %v1794_v22 = vadd.f32 %v4518_v31, %v1739_v21 }
 0x219   : > { %v3526_v38 = vpop.f32.mrf.mxu0  ;;  %v1795_v60 = vadd.f32 %v4518_v31, %v1742_v35  ;;  %v1798_v14 = vadd.f32 %v4518_v31, %v1755_v36 }
 0x21a   : > { %v2110_v61 = vadd.f32 %v3526_v38, %v4513_v7  ;;  %3639 = vmatprep.mubr.bf16.mxu1 %v2199_v19  ;;  %v2177_v20 = vmul.f32 %v2099_v42, %v1784_v40 }
 0x21b   : > { %v2101_v46 = vpop.f32.mrf.mxu0  ;;  %3640 = vmatmul.mubr.bf16.gmra.mxu1 %v2200_v32  ;;  %v3498_v32 = vpop.f32.mrf.mxu1 }
 0x21c   : > { %v2180_v47 = vmul.f32 %v2110_v61, %v1787_v26  ;;  %v2102_v10 = vadd.f32 %v4513_v7, %v2101_v46  ;;  %v1758_v26 = vadd.f32 %v3498_v32, %v4504_v37  ;;  %v4935_v46 = vld [vmem:[#allocation8_spill] sm:$0xff] }
 0x21d   : > { %v3529_v58 = vpop.f32.mrf.mxu0  ;;  %v1749_v38 = vpop.f32.mrf.mxu1 }
 0x21e   : > { %v2202_v51 = vpack.c.bf16 %v2180_v47, %v2179_v48  ;;  %v2178_v16 = vmul.f32 %v2102_v10, %v1785_v45  ;;  %v2123_v25 = vadd.f32 %v3529_v58, %v4513_v7  ;;  %v1747_v45 = vadd.f32 %v1746_v30, %v4935_v46  ;;  %v4936_v47 = vld [vmem:[#allocation9_spill] sm:$0xff] }
 0x21f   : > { %v2114_v27 = vpop.f32.mrf.mxu0  ;;  %v1750_v10 = vadd.f32 %v1749_v38, %v4936_v47  ;;  %v1799_v4 = vadd.f32 %v4518_v31, %v1758_v26 }
 0x220   : > { %v2201_v62 = vpack.c.bf16 %v2178_v16, %v2177_v20  ;;  %v2115_v54 = vadd.f32 %v4513_v7, %v2114_v27  ;;  %v2183_v17 = vmul.f32 %v2123_v25, %v1790_v49 }
 0x221   : > { %v3530_v53 = vpop.f32.mrf.mxu0  ;;  %v1797_v15 = vadd.f32 %v4518_v31, %v1750_v10 }
 0x222   : > { %v2126_v18 = vadd.f32 %v3530_v53, %v4513_v7  ;;  %3643 = vmatprep.mubr.bf16.mxu1 %v2201_v62  ;;  %v2181_v0 = vmul.f32 %v2115_v54, %v1788_v34 }
 0x223   : > { %v2117_v50 = vpop.f32.mrf.mxu0  ;;  %3644 = vmatmul.mubr.bf16.gmra.mxu1 %v2202_v51  ;;  %v1796_v51 = vadd.f32 %v4518_v31, %v1747_v45 }
 0x224   : > { %v2184_v56 = vmul.f32 %v2126_v18, %v1791_v13  ;;  %v2118_v43 = vadd.f32 %v4513_v7, %v2117_v50  ;;  %v3545_v13 = vpop.f32.mrf.mxu1 }
 0x225   : > { %v3533_v57 = vpop.f32.mrf.mxu0 }
 0x226   : > { %v2204_v39 = vpack.c.bf16 %v2184_v56, %v2183_v17  ;;  %v2182_v63 = vmul.f32 %v2118_v43, %v1789_v55  ;;  %v2139_v33 = vadd.f32 %v3533_v57, %v4513_v7  ;;  %v2279_v54 = vpop.f32.mrf.mxu1 }
 0x227   : > { %v2130_v6 = vpop.f32.mrf.mxu0 }
 0x228   : > { %v2203_v8 = vpack.c.bf16 %v2182_v63, %v2181_v0  ;;  %v2131_v44 = vadd.f32 %v4513_v7, %v2130_v6  ;;  %v2187_v24 = vmul.f32 %v2139_v33, %v1794_v22  ;;  %v3546_v18 = vpop.f32.mrf.mxu1 }
 0x229   : > { %v3534_v11 = vpop.f32.mrf.mxu0 }
 0x22a   : > { %v2142_v52 = vadd.f32 %v3534_v11, %v4513_v7  ;;  %3647 = vmatprep.mubr.bf16.mxu1 %v2203_v8  ;;  %v2185_v42 = vmul.f32 %v2131_v44, %v1792_v41  ;;  %v4641_v34 = vpop.f32.mrf.mxu1 }
 0x22b   : > { %v2133_v1 = vpop.f32.mrf.mxu0  ;;  %3648 = vmatmul.mubr.bf16.gmra.mxu1 %v2204_v39 }
 0x22c   : > { %v2188_v59 = vmul.f32 %v2142_v52, %v1795_v60  ;;  %v2134_v19 = vadd.f32 %v4513_v7, %v2133_v1  ;;  %v4643_v50 = vpop.f32.mrf.mxu1 }
 0x22d   : > { %v3537_v23 = vpop.f32.mrf.mxu0 }
 0x22e   : > { %v2206_v61 = vpack.c.bf16 %v2188_v59, %v2187_v24  ;;  %v2186_v40 = vmul.f32 %v2134_v19, %v1793_v2  ;;  %v2155_v12 = vadd.f32 %v3537_v23, %v4513_v7  ;;  %v4645_v55 = vpop.f32.mrf.mxu1 }
 0x22f   : > { %v2146_v48 = vpop.f32.mrf.mxu0 }
 0x230   : > { %v2205_v29 = vpack.c.bf16 %v2186_v40, %v2185_v42  ;;  %v2147_v20 = vadd.f32 %v4513_v7, %v2146_v48  ;;  %v2191_v27 = vmul.f32 %v2155_v12, %v1798_v14  ;;  %v4647_v31 = vpop.f32.mrf.mxu1 }
 0x231   : > { %v3538_v58 = vpop.f32.mrf.mxu0 }
 0x232   : > { %v2158_v37 = vadd.f32 %v3538_v58, %v4513_v7  ;;  %3651 = vmatprep.mubr.bf16.mxu1 %v2205_v29  ;;  %v2189_v62 = vmul.f32 %v2147_v20, %v1796_v51  ;;  %v4649_v17 = vpop.f32.mrf.mxu1 }
 0x233   : > { %v2149_v16 = vpop.f32.mrf.mxu0  ;;  %3652 = vmatmul.mubr.bf16.gmra.mxu1 %v2206_v61 }
 0x234   : > { %v2192_v3 = vmul.f32 %v2158_v37, %v1799_v4  ;;  %v2150_v25 = vadd.f32 %v4513_v7, %v2149_v16  ;;  %v4651_v7 = vpop.f32.mrf.mxu1  ;;  %v2790_v4 = vld [vmem:[%s4720_s28 + $0x10] sm:$0xff] }
 0x235   : > { %v3581_v39 = vpop.f32.mrf.mxu0 }
 0x236   : > { %v2208_v28 = vpack.c.bf16 %v2192_v3, %v2191_v27  ;;  %v2190_v53 = vmul.f32 %v2150_v25, %v1797_v15  ;;  %v4653_v56 = vpop.f32.mrf.mxu1  ;;  %v2461_v58 = vadd.f32 %v3581_v39, %v3545_v13  ;;  %v2788_v15 = vld [vmem:[%s4720_s28] sm:$0xff] }
 0x237   : > { %v2452_v5 = vpop.f32.mrf.mxu0 }
 0x238   : > { %v2207_v49 = vpack.c.bf16 %v2190_v53, %v2189_v62  ;;  %v4655_v43 = vpop.f32.mrf.mxu1  ;;  %v2453_v20 = vadd.f32 %v2452_v5, %v2279_v54 }
 0x239   : > { %v3582_v9 = vpop.f32.mrf.mxu0 }
 0x23a   : > { %3655 = vmatprep.mubr.bf16.mxu1 %v2207_v49  ;;  %v4657_v21 = vpop.f32.mrf.mxu1  ;;  %v2464_v27 = vadd.f32 %v3582_v9, %v3546_v18  ;;  %v2789_v18 = vld [vmem:[%s4720_s28 + $0x8] sm:$0xff] }
 0x23b   : > { %3656 = vmatmul.mubr.bf16.gmra.mxu1 %v2208_v28  ;;  %v2455_v8 = vpop.f32.mrf.mxu0  ;;  %v2791_v28 = vld [vmem:[%s4720_s28 + $0x18] sm:$0xff] }
 0x23c   : > { %v4659_v30 = vpop.f32.mrf.mxu1  ;;  %v2456_v53 = vadd.f32 %v2455_v8, %v4641_v34 }
 0x23d   : > { %v3585_v11 = vpop.f32.mrf.mxu0 }
 0x23e   : > { %v4661_v57 = vpop.f32.mrf.mxu1  ;;  %v2477_v5 = vadd.f32 %v3585_v11, %v4643_v50 }
 0x23f   : > { %v2468_v60 = vpop.f32.mrf.mxu0 }
 0x240   : > { %v4663_v35 = vpop.f32.mrf.mxu1 }
 0x241   : > { %v3586_v52 = vpop.f32.mrf.mxu0 }
 0x242   : > { %v4665_v0 = vpop.f32.mrf.mxu1  ;;  %v2480_v50 = vadd.f32 %v3586_v52, %v4647_v31 }
 0x243   : > { %v4681_v1 = vpop.f32.mrf.mxu0 }
 0x244   : > { %v4667_v63 = vpop.f32.mrf.mxu1 }
 0x245   : > { %v4685_v24 = vpop.f32.mrf.mxu0 }
 0x246   : > { %v4669_v6 = vpop.f32.mrf.mxu1  ;;  %v2493_v31 = vadd.f32 %v4685_v24, %v4651_v7 }
 0x247   : > { %v4689_v19 = vpop.f32.mrf.mxu0 }
 0x248   : > { %v4671_v33 = vpop.f32.mrf.mxu1 }
 0x249   : > { %v4693_v38 = vpop.f32.mrf.mxu0 }
 0x24a   : > { %v4673_v32 = vpop.f32.mrf.mxu1  ;;  %v2496_v7 = vadd.f32 %v4693_v38, %v4655_v43 }
 0x24b   : > { %v4697_v26 = vpop.f32.mrf.mxu0 }
 0x24c   : > { %v4675_v22 = vpop.f32.mrf.mxu1 }
 0x24d   : > { %v4701_v61 = vpop.f32.mrf.mxu0 }
 0x24e   : > { %v4677_v44 = vpop.f32.mrf.mxu1  ;;  %v2509_v43 = vadd.f32 %v4701_v61, %v4659_v30 }
 0x24f   : > { %v4705_v46 = vpop.f32.mrf.mxu0 }
 0x250   : > { %v4679_v41 = vpop.f32.mrf.mxu1 }
 0x251   : > { %v4709_v48 = vpop.f32.mrf.mxu0 }
 0x252   : > { %v4683_v2 = vpop.f32.mrf.mxu1  ;;  %v2512_v30 = vadd.f32 %v4709_v48, %v4663_v35 }
 0x253   : > { %v4714_v10 = vpop.f32.mrf.mxu0 }
 0x254   : > { %v4687_v59 = vpop.f32.mrf.mxu1 }
 0x255   : > { %v4724_v29 = vpop.f32.mrf.mxu0 }
 0x256   : > { %v4691_v36 = vpop.f32.mrf.mxu1  ;;  %v2525_v35 = vadd.f32 %v4724_v29, %v4667_v63 }
 0x257   : > { %v4729_v51 = vpop.f32.mrf.mxu0 }
 0x258   : > { %v4695_v23 = vpop.f32.mrf.mxu1 }
 0x259   : > { %v4737_v54 = vpop.f32.mrf.mxu0 }
 0x25a   : > { %v4699_v42 = vpop.f32.mrf.mxu1  ;;  %v2528_v63 = vadd.f32 %v4737_v54, %v4671_v33 }
 0x25c   : > { %v4703_v40 = vpop.f32.mrf.mxu1 }
 0x25e   : > { %v4707_v45 = vpop.f32.mrf.mxu1 }
 0x260   : > { %v4712_v47 = vpop.f32.mrf.mxu1 }
 0x262   : > { %v4722_v12 = vpop.f32.mrf.mxu1 }
 0x2c3   : > { %v3629_v14 = vpop.f32.mrf.mxu1 }
 0x2c4   : > { %v2670_v37 = vadd.f32 %v3629_v14, %v2461_v58  ;;  %v2794_v58 = vld [vmem:[%s4720_s28 + $0x30] sm:$0xff]  ;;  %v2469_v14 = vadd.f32 %v2468_v60, %v4645_v55  ;;  %v2472_v55 = vadd.f32 %v4681_v1, %v4649_v17  ;;  %v2485_v17 = vadd.f32 %v4689_v19, %v4653_v56 }
 0x2c5   : > { %v2661_v16 = vpop.f32.mrf.mxu1  ;;  %v2488_v56 = vadd.f32 %v4697_v26, %v4657_v21  ;;  %v2501_v21 = vadd.f32 %v4705_v46, %v4661_v57  ;;  %v2504_v57 = vadd.f32 %v4714_v10, %v4665_v0  ;;  %v2517_v0 = vadd.f32 %v4729_v51, %v4669_v6 }
 0x2c6   : > { %v2822_v3 = vadd.f32 %v2790_v4, %v2670_v37  ;;  %v2662_v25 = vadd.f32 %v2661_v16, %v2453_v20  ;;  %v4745_v37 = vpop.f32.mrf.mxu0 }
 0x2c7   : > { %v3630_v62 = vpop.f32.mrf.mxu1  ;;  %v2520_v6 = vadd.f32 %v4745_v37, %v4673_v32 }
 0x2c8   : > { %2854 = vst [vmem:[%s4734_s23 + $0x10] sm:$0xff] %v2822_v3  ;;  %v2820_v49 = vadd.f32 %v2788_v15, %v2662_v25  ;;  %v2673_v13 = vadd.f32 %v3630_v62, %v2464_v27  ;;  %v2792_v15 = vld [vmem:[%s4720_s28 + $0x20] sm:$0xff]  ;;  %v2795_v25 = vld [vmem:[%s4720_s28 + $0x38] sm:$0xff] }
 0x2c9   : > { %v2664_v39 = vpop.f32.mrf.mxu1 }
 0x2ca   : > { %2852 = vst [vmem:[%s4734_s23] sm:$0xff] %v2820_v49  ;;  %v2823_v9 = vadd.f32 %v2791_v28, %v2673_v13  ;;  %v2665_v34 = vadd.f32 %v2664_v39, %v2456_v53  ;;  %v4754_v28 = vpop.f32.mrf.mxu0  ;;  %v2793_v49 = vld [vmem:[%s4720_s28 + $0x28] sm:$0xff] }
 0x2cb   : > { %v3633_v8 = vpop.f32.mrf.mxu1  ;;  %v2541_v33 = vadd.f32 %v4754_v28, %v4675_v22 }
 0x2cc   : > { %2855 = vst [vmem:[%s4734_s23 + $0x18] sm:$0xff] %v2823_v9  ;;  %v2821_v4 = vadd.f32 %v2789_v18, %v2665_v34  ;;  %v2686_v20 = vadd.f32 %v3633_v8, %v2477_v5  ;;  %v2798_v18 = vld [vmem:[%s4720_s28 + $0x50] sm:$0xff]  ;;  %v4764_v9 = vpop.f32.mrf.mxu0  ;;  %v2796_v8 = vld [vmem:[%s4720_s28 + $0x40] sm:$0xff] }
 0x2cd   : > { %v2677_v16 = vpop.f32.mrf.mxu1  ;;  %v2533_v32 = vadd.f32 %v4764_v9, %v4677_v44 }
 0x2ce   : > { %2853 = vst [vmem:[%s4734_s23 + $0x8] sm:$0xff] %v2821_v4  ;;  %v2826_v11 = vadd.f32 %v2794_v58, %v2686_v20  ;;  %v2678_v27 = vadd.f32 %v2677_v16, %v2469_v14  ;;  %v2799_v4 = vld [vmem:[%s4720_s28 + $0x58] sm:$0xff]  ;;  %v4774_v16 = vpop.f32.mrf.mxu0 }
 0x2cf   : > { %v3634_v3 = vpop.f32.mrf.mxu1  ;;  %v2544_v22 = vadd.f32 %v4774_v16, %v4679_v41 }
 0x2d0   : > { %2858 = vst [vmem:[%s4734_s23 + $0x30] sm:$0xff] %v2826_v11  ;;  %v2824_v60 = vadd.f32 %v2792_v15, %v2678_v27  ;;  %v2689_v62 = vadd.f32 %v3634_v3, %v2480_v50  ;;  %v2797_v50 = vld [vmem:[%s4720_s28 + $0x48] sm:$0xff]  ;;  %v2802_v3 = vld [vmem:[%s4720_s28 + $0x70] sm:$0xff] }
 0x2d1   : > { %v2680_v53 = vpop.f32.mrf.mxu1 }
 0x2d2   : > { %2856 = vst [vmem:[%s4734_s23 + $0x20] sm:$0xff] %v2824_v60  ;;  %v2827_v52 = vadd.f32 %v2795_v25, %v2689_v62  ;;  %v2681_v13 = vadd.f32 %v2680_v53, %v2472_v55  ;;  %v2535_v55 = vpop.f32.mrf.mxu0  ;;  %v2800_v62 = vld [vmem:[%s4720_s28 + $0x60] sm:$0xff] }
 0x2d3   : > { %v3637_v39 = vpop.f32.mrf.mxu1  ;;  %v2536_v44 = vadd.f32 %v2535_v55, %v4683_v2 }
 0x2d4   : > { %2859 = vst [vmem:[%s4734_s23 + $0x38] sm:$0xff] %v2827_v52  ;;  %v2825_v1 = vadd.f32 %v2793_v49, %v2681_v13  ;;  %v2702_v5 = vadd.f32 %v3637_v39, %v2493_v31  ;;  %v2803_v31 = vld [vmem:[%s4720_s28 + $0x78] sm:$0xff]  ;;  %v3605_v13 = vpop.f32.mrf.mxu0 }
 0x2d5   : > { %v2693_v34 = vpop.f32.mrf.mxu1 }
 0x2d6   : > { %2857 = vst [vmem:[%s4734_s23 + $0x28] sm:$0xff] %v2825_v1  ;;  %v2830_v24 = vadd.f32 %v2798_v18, %v2702_v5  ;;  %v2694_v58 = vadd.f32 %v2693_v34, %v2485_v17  ;;  %v2801_v18 = vld [vmem:[%s4720_s28 + $0x68] sm:$0xff]  ;;  %v2806_v5 = vld [vmem:[%s4720_s28 + $0x90] sm:$0xff] }
 0x2d7   : > { %v3638_v14 = vpop.f32.mrf.mxu1 }
 0x2d8   : > { %2862 = vst [vmem:[%s4734_s23 + $0x50] sm:$0xff] %v2830_v24  ;;  %v2828_v19 = vadd.f32 %v2796_v8, %v2694_v58  ;;  %v2705_v20 = vadd.f32 %v3638_v14, %v2496_v7  ;;  %v2548_v8 = vpop.f32.mrf.mxu0  ;;  %v2804_v24 = vld [vmem:[%s4720_s28 + $0x80] sm:$0xff] }
 0x2d9   : > { %v2696_v15 = vpop.f32.mrf.mxu1 }
 0x2da   : > { %2860 = vst [vmem:[%s4734_s23 + $0x40] sm:$0xff] %v2828_v19  ;;  %v2831_v38 = vadd.f32 %v2799_v4, %v2705_v20  ;;  %v2697_v11 = vadd.f32 %v2696_v15, %v2488_v56  ;;  %v2807_v4 = vld [vmem:[%s4720_s28 + $0x98] sm:$0xff]  ;;  %v3606_v19 = vpop.f32.mrf.mxu0  ;;  %v2805_v15 = vld [vmem:[%s4720_s28 + $0x88] sm:$0xff] }
 0x2db   : > { %v3641_v27 = vpop.f32.mrf.mxu1 }
 0x2dc   : > { %2863 = vst [vmem:[%s4734_s23 + $0x58] sm:$0xff] %v2831_v38  ;;  %v2829_v26 = vadd.f32 %v2797_v50, %v2697_v11  ;;  %v2718_v25 = vadd.f32 %v3641_v27, %v2509_v43  ;;  %v2810_v38 = vld [vmem:[%s4720_s28 + $0xb0] sm:$0xff]  ;;  %v2551_v27 = vpop.f32.mrf.mxu0 }
 0x2dd   : > { %v2709_v60 = vpop.f32.mrf.mxu1 }
 0x2de   : > { %2861 = vst [vmem:[%s4734_s23 + $0x48] sm:$0xff] %v2829_v26  ;;  %v2834_v61 = vadd.f32 %v2802_v3, %v2718_v25  ;;  %v2710_v53 = vadd.f32 %v2709_v60, %v2501_v21  ;;  %v2808_v21 = vld [vmem:[%s4720_s28 + $0xa0] sm:$0xff]  ;;  %v2811_v60 = vld [vmem:[%s4720_s28 + $0xb8] sm:$0xff] }
 0x2df   : > { %v3642_v49 = vpop.f32.mrf.mxu1 }
 0x2e0   : > { %2866 = vst [vmem:[%s4734_s23 + $0x70] sm:$0xff] %v2834_v61  ;;  %v2832_v46 = vadd.f32 %v2800_v62, %v2710_v53  ;;  %v2721_v52 = vadd.f32 %v3642_v49, %v2512_v30  ;;  %v3609_v30 = vpop.f32.mrf.mxu0  ;;  %v2809_v53 = vld [vmem:[%s4720_s28 + $0xa8] sm:$0xff]  ;;  %v2557_v49 = vadd.f32 %v3605_v13, %v4687_v59 }
 0x2e1   : > { %v2712_v39 = vpop.f32.mrf.mxu1 }
 0x2e2   : > { %2864 = vst [vmem:[%s4734_s23 + $0x60] sm:$0xff] %v2832_v46  ;;  %v2835_v48 = vadd.f32 %v2803_v31, %v2721_v52  ;;  %v2713_v17 = vadd.f32 %v2712_v39, %v2504_v57  ;;  %v2814_v57 = vld [vmem:[%s4720_s28 + $0xd0] sm:$0xff]  ;;  %v2549_v46 = vadd.f32 %v2548_v8, %v4691_v36  ;;  %v2564_v52 = vpop.f32.mrf.mxu0  ;;  %v2573_v8 = vadd.f32 %v3609_v30, %v4703_v40 }
 0x2e3   : > { %v3645_v1 = vpop.f32.mrf.mxu1 }
 0x2e4   : > { %2867 = vst [vmem:[%s4734_s23 + $0x78] sm:$0xff] %v2835_v48  ;;  %v2833_v10 = vadd.f32 %v2801_v18, %v2713_v17  ;;  %v2734_v34 = vadd.f32 %v3645_v1, %v2525_v35  ;;  %v2812_v18 = vld [vmem:[%s4720_s28 + $0xc0] sm:$0xff]  ;;  %v2560_v35 = vadd.f32 %v3606_v19, %v4695_v23  ;;  %v2815_v17 = vld [vmem:[%s4720_s28 + $0xd8] sm:$0xff]  ;;  %v2552_v1 = vadd.f32 %v2551_v27, %v4699_v42 }
 0x2e5   : > { %v2725_v7 = vpop.f32.mrf.mxu1 }
 0x2e6   : > { %2865 = vst [vmem:[%s4734_s23 + $0x68] sm:$0xff] %v2833_v10  ;;  %v2838_v29 = vadd.f32 %v2806_v5, %v2734_v34  ;;  %v2726_v58 = vadd.f32 %v2725_v7, %v2517_v0  ;;  %v3610_v0 = vpop.f32.mrf.mxu0  ;;  %v2813_v34 = vld [vmem:[%s4720_s28 + $0xc8] sm:$0xff] }
 0x2e7   : > { %v3646_v14 = vpop.f32.mrf.mxu1  ;;  %v2576_v40 = vadd.f32 %v3610_v0, %v4712_v47 }
 0x2e8   : > { %2870 = vst [vmem:[%s4734_s23 + $0x90] sm:$0xff] %v2838_v29  ;;  %v2836_v51 = vadd.f32 %v2804_v24, %v2726_v58  ;;  %v2737_v56 = vadd.f32 %v3646_v14, %v2528_v63  ;;  %v2818_v63 = vld [vmem:[%s4720_s28 + $0xf0] sm:$0xff]  ;;  %v2565_v29 = vadd.f32 %v2564_v52, %v4707_v45  ;;  %v2567_v14 = vpop.f32.mrf.mxu0 }
 0x2e9   : > { %v2728_v20 = vpop.f32.mrf.mxu1  ;;  %v2568_v45 = vadd.f32 %v2567_v14, %v4722_v12 }
 0x2ea   : > { %2868 = vst [vmem:[%s4734_s23 + $0x80] sm:$0xff] %v2836_v51  ;;  %v2839_v54 = vadd.f32 %v2807_v4, %v2737_v56  ;;  %v2729_v50 = vadd.f32 %v2728_v20, %v2520_v6  ;;  %v2816_v6 = vld [vmem:[%s4720_s28 + $0xe0] sm:$0xff]  ;;  %v2819_v20 = vld [vmem:[%s4720_s28 + $0xf8] sm:$0xff] }
 0x2eb   : > { %v3649_v43 = vpop.f32.mrf.mxu1 }
 0x2ec   : > { %2871 = vst [vmem:[%s4734_s23 + $0x98] sm:$0xff] %v2839_v54  ;;  %v2837_v37 = vadd.f32 %v2805_v15, %v2729_v50  ;;  %v2750_v11 = vadd.f32 %v3649_v43, %v2541_v33  ;;  %v2817_v50 = vld [vmem:[%s4720_s28 + $0xe8] sm:$0xff]  ;;  %s3776_s28 = sshll.u32 %s3834_s29, 4  ;;  %s3777_s28 = int_to_ptr.vmem [resolvable:$false] %s3776_s28 }
 0x2ed   : > { %v2741_v3 = vpop.f32.mrf.mxu1  ;;  %s3778_s20 = scalar_lea.vmem %s3777_s28, 8192  ;;  %p3779_p0 = scmp.lt.s32.totalorder %s4856_s19, %s3777_s28 }
 0x2ee   : > { %2869 = vst [vmem:[%s4734_s23 + $0x88] sm:$0xff] %v2837_v37  ;;  %v2842_v28 = vadd.f32 %v2810_v38, %v2750_v11  ;;  %v2742_v26 = vadd.f32 %v2741_v3, %v2533_v32  ;;  %p3780_p1 = scmp.lt.s32.totalorder %s3778_s20, %s3772_s26 }
 0x2ef   : > { %v3650_v25 = vpop.f32.mrf.mxu1 }
 0x2f0   : > { %2874 = vst [vmem:[%s4734_s23 + $0xb0] sm:$0xff] %v2842_v28  ;;  %v2840_v9 = vadd.f32 %v2808_v21, %v2742_v26  ;;  %v2753_v62 = vadd.f32 %v3650_v25, %v2544_v22  ;;  %p3781_p2 = por %p3780_p1, %p3779_p0 }
 0x2f1   : > { %v2744_v61 = vpop.f32.mrf.mxu1 }
 0x2f2   : > { %2872 = vst [vmem:[%s4734_s23 + $0xa0] sm:$0xff] %v2840_v9  ;;  %v2843_v41 = vadd.f32 %v2811_v60, %v2753_v62  ;;  %v2745_v16 = vadd.f32 %v2744_v61, %v2536_v44  ;;  %p3782_p3 = pnand %p3781_p2, %p3775_p13 }
 0x2f3   : > { %v3653_v31 = vpop.f32.mrf.mxu1 }
 0x2f4   : > { %2875 = vst [vmem:[%s4734_s23 + $0xb8] sm:$0xff] %v2843_v41  ;;  %v2841_v2 = vadd.f32 %v2809_v53, %v2745_v16  ;;  %v2766_v55 = vadd.f32 %v3653_v31, %v2557_v49 }
 0x2f5   : > { %v2757_v39 = vpop.f32.mrf.mxu1 }
 0x2f6   : > { %2873 = vst [vmem:[%s4734_s23 + $0xa8] sm:$0xff] %v2841_v2  ;;  %v2846_v59 = vadd.f32 %v2814_v57, %v2766_v55  ;;  %v2758_v13 = vadd.f32 %v2757_v39, %v2549_v46 }
 0x2f7   : > { %v3654_v48 = vpop.f32.mrf.mxu1 }
 0x2f8   : > { %2878 = vst [vmem:[%s4734_s23 + $0xd0] sm:$0xff] %v2846_v59  ;;  %v2844_v36 = vadd.f32 %v2812_v18, %v2758_v13  ;;  %v2769_v5 = vadd.f32 %v3654_v48, %v2560_v35 }
 0x2f9   : > { %v2760_v10 = vpop.f32.mrf.mxu1 }
 0x2fa   : > { %2876 = vst [vmem:[%s4734_s23 + $0xc0] sm:$0xff] %v2844_v36  ;;  %v2847_v23 = vadd.f32 %v2815_v17, %v2769_v5  ;;  %v2761_v7 = vadd.f32 %v2760_v10, %v2552_v1 }
 0x2fb   : > { %v3657_v24 = vpop.f32.mrf.mxu1 }
 0x2fc   : > { %2879 = vst [vmem:[%s4734_s23 + $0xd8] sm:$0xff] %v2847_v23  ;;  %v2845_v42 = vadd.f32 %v2813_v34, %v2761_v7  ;;  %v2782_v58 = vadd.f32 %v3657_v24, %v2573_v8 }
 0x2fd   : > { %v2773_v4 = vpop.f32.mrf.mxu1 }
 0x2fe   : > { %2877 = vst [vmem:[%s4734_s23 + $0xc8] sm:$0xff] %v2845_v42  ;;  %v2850_v51 = vadd.f32 %v2818_v63, %v2782_v58  ;;  %v2774_v56 = vadd.f32 %v2773_v4, %v2565_v29 }
 0x2ff   : > { %v3658_v19 = vpop.f32.mrf.mxu1 }
 0x300   : > { %2882 = vst [vmem:[%s4734_s23 + $0xf0] sm:$0xff] %v2850_v51  ;;  %v2848_v15 = vadd.f32 %v2816_v6, %v2774_v56  ;;  %v2785_v33 = vadd.f32 %v3658_v19, %v2576_v40 }
 0x301   : > { %v2776_v54 = vpop.f32.mrf.mxu1 }
 0x302   : > { %2880 = vst [vmem:[%s4734_s23 + $0xe0] sm:$0xff] %v2848_v15  ;;  %v2851_v47 = vadd.f32 %v2819_v20, %v2785_v33  ;;  %v2777_v43 = vadd.f32 %v2776_v54, %v2568_v45 }
 0x304   : > { %2883 = vst [vmem:[%s4734_s23 + $0xf8] sm:$0xff] %v2851_v47  ;;  %v2849_v12 = vadd.f32 %v2817_v50, %v2777_v43 }
 0x306   : > { %2881 = vst [vmem:[%s4734_s23 + $0xe8] sm:$0xff] %v2849_v12 }
 0x307   : > { %3785 = shalt.err (!%p3782_p3)
}
 0x308   : > { %s3786_s30 = scalar_lea.hbm %s4854_s18, 4096  ;;  %s3790_s6 = scalar_lea.hbm %s4918_s16, 8192 }
 0x309   : > { %p3787_p4 = scmp.ne.s32.totalorder %s4854_s18, %s3786_s30  ;;  %p3791_p9 = scmp.lt.s32.totalorder %s4854_s18, %s4918_s16 }
 0x30a   : > { %p3792_p10 = scmp.lt.s32.totalorder %s3790_s6, %s3786_s30 }
 0x30b   : > { %p3788_p7 = pnand %p3787_p4, %p3960_p5 }
 0x30c   : > { %p3793_p11 = por %p3792_p10, %p3791_p9 }
 0x30d   : > { %p3789_p8 = pneg %p3788_p7 }
 0x30f   : > { %p3794_p12 = pnand %p3793_p11, %p3789_p8 }
 0x311   : > { %3797 = shalt.err (!%p3794_p12)
}
 0x312   : > { %s3835_s26 = smov 128   ;;  %s3836_s28 = smov 8  }
 0x313   : > { %3659 = dma.vmem_to_hbm [thread:$0]  (%p3960_p5), %s4856_s19, 4096, %s4854_s18, %s4862_s25, %s3835_s26, %s3835_s26, %s3836_s28  }
 0x314 PF: > { %p3665_p13 = scmp.ge.s32.totalorder %s3832_s24, 2  ;;  %s2913_s20 = sand.u32 1, %s3820_s21  }
 0x315   : > { %s2914_s30 = scalar_lea.sflag [#allocation3], %s2913_s20 }
 0x316   : > { %p3662_p0 = pnand %p3665_p13, %p3964_p6 }
 0x318   : > { %p3663_p1 = pneg %p3662_p0 }
 0x31a   : > { %3815 = dma.done.wait (%p3663_p1), %s2914_s30, 4096  }
 0x31b   : > { %3817 = vsyncadd (%p3663_p1), %s2914_s30, 4294963200  ;;  %s4937_s24 = sld [smem:[#allocation6_spill]]  ;;  %s4940_s21 = smov %s3824_s22 }
 0x31c   : > { %s4938_s23 = sld [smem:[#allocation5_spill]] }
 0x31d   : > { %s4939_s27 = sld [smem:[#allocation7_spill]] }
 0x321   : > { %p26_p2 = scmp.ge.s32.totalorder %s4937_s24, 4  }
 0x322   : > { %s4941_s22 = smov %s4938_s23 }
 0x323   : > { %s4942_s23 = smov %s4939_s27  ;;  %28 = sbr.rel (!%p26_p2) target bundleno = 7 (0x7), region = 128 }
 0x328   :  { %2919 = vsyncpa [#allocation3], 1 }
 0x329   :  { %2921 = vsyncpa [#allocation3 + $0x1], 1 }

</bundles_post_ra>
